<compile_context>
chip_gen: v5e
topology: v5e:2x2
jax: 0.10.0
libtpu: 0.0.40
codegen_flags: <defaults>
</compile_context>

<pallas_src>
import functools

import numpy as np
import jax
import jax.numpy as jnp
from jax.experimental import pallas as pl
from jax.experimental.pallas import tpu as pltpu

EPS = 1e-5


# ----------------------------- kernel math -----------------------------

def _sigmoid(z, in_kernel):
    # exp runs on the EUP; in-kernel the divide becomes an approximate EUP
    # reciprocal (pl.reciprocal only lowers inside a Pallas kernel, so the
    # plain-JAX reference path uses an exact divide).
    d = 1.0 + jnp.exp(-z)
    return pl.reciprocal(d, approx=True) if in_kernel else 1.0 / d


def _bn_train(z, gamma, beta):
    """Training-mode BatchNorm2d on a lane-batched (C, N*P) f32 slab.

    Single-pass sum / sum-of-squares, biased variance, eps=1e-5 (matching
    nn.BatchNorm2d defaults; running stats are not modelled).
    NOTE: E[x^2]-E[x]^2 can cancel badly when |mean| >> std; fine at these
    activation scales, switch to a centered two-pass reduction if needed."""
    cnt = float(z.shape[1])
    mu = jnp.sum(z, axis=1, keepdims=True) / cnt
    var = jnp.sum(z * z, axis=1, keepdims=True) / cnt - mu * mu
    scale = gamma * jax.lax.rsqrt(var + EPS)      # (C, 1)
    shift = beta - mu * scale                     # (C, 1)
    return z * scale + shift


def _saf_compute(x, res, p1, p2, bdn, bup, w1, wb1, w2, wb2, prm,
                 *, n_img, p1_pix, in_kernel):
    """Shared math for the kernel (on loaded VMEM values) and the reference.

    Layout: channels on sublanes, batch folded into the pixel/lane axis.

    Shapes (C channels, HW full-res pixels per image, P1/P2 conv pixels):
      x, res : (C, N*HW) f32         p1 : (9C, N*P1) bf16
      p2     : (9C, N*P2) bf16       bdn: (N*HW, N*P2) bf16 = kron(I_N, Mdn^T)
      bup    : (N*P2, N*HW) bf16     w1, w2 : (C, 9C) bf16
      wb1, wb2 : (C, C) bf16         prm : (C, 8) f32 (BN gammas / betas)
    Returns the fused output as a (C, N*HW) f32 slab."""
    f32, bf16 = jnp.float32, jnp.bfloat16
    c, n_hw = x.shape
    hw = n_hw // n_img

    g1, be1, gb1, beb1, g2, be2, gb2, beb2 = [prm[:, i:i + 1] for i in range(8)]

    # --- R1: 3x3 conv (s1, p0) -> BN -> ReLU -> AdaptiveAvgPool2d(1), then + x
    c1 = jnp.dot(w1, p1, preferred_element_type=f32)                # (C, N*P1)
    c1 = jnp.maximum(_bn_train(c1, g1, be1), 0.0)
    # Per-image global-average pool + broadcast back over that image's lanes,
    # via lane-index masks (no unaligned slices, no concatenates).
    lane_p = jax.lax.broadcasted_iota(jnp.int32, (1, c1.shape[1]), 1)
    lane_o = jax.lax.broadcasted_iota(jnp.int32, (1, n_hw), 1)
    pool = jnp.zeros((c, n_hw), f32)
    inv_p1 = 1.0 / float(p1_pix)
    for n in range(n_img):
        msk_p = ((lane_p >= n * p1_pix) & (lane_p < (n + 1) * p1_pix)).astype(f32)
        msk_o = ((lane_o >= n * hw) & (lane_o < (n + 1) * hw)).astype(f32)
        mean_n = jnp.sum(msk_p * c1, axis=1, keepdims=True) * inv_p1   # (C, 1)
        pool = pool + msk_o * mean_n
    r1 = x + pool                                                    # (C, N*HW)

    # --- B1: 1x1 conv -> BN  (x_out)
    x_out = _bn_train(
        jnp.dot(wb1, r1.astype(bf16), preferred_element_type=f32), gb1, beb1)

    # --- R2: 3x3 conv (s2, p1) -> BN -> ReLU, + bilinear-downsampled residual
    c2 = jnp.maximum(
        _bn_train(jnp.dot(w2, p2, preferred_element_type=f32), g2, be2), 0.0)
    res_dn = jnp.dot(res.astype(bf16), bdn, preferred_element_type=f32)
    r2 = c2 + res_dn                                                 # (C, N*P2)

    # --- B2: 1x1 conv -> BN, then bilinear upsample back to (H, W)
    y_small = _bn_train(
        jnp.dot(wb2, r2.astype(bf16), preferred_element_type=f32), gb2, beb2)
    y_out = jnp.dot(y_small.astype(bf16), bup, preferred_element_type=f32)

    # --- fusion tail: one lane-dense f32 VPU pass over (C, N*HW)
    # (.squeeze() in the PyTorch code is a no-op for these shapes.)
    wei1 = _sigmoid(x_out + y_out, in_kernel)
    xyo = 2.0 * (res + (x - res) * wei1)          # == 2*x*w + 2*res*(1-w)
    wei2 = _sigmoid(xyo, in_kernel)
    xa = x + res
    return xa * (1.0 + wei2)                       # == xa*wei2 + xa


def saf_kernel(x_ref, res_ref, p1_ref, p2_ref, bdn_ref, bup_ref,
               w1_ref, wb1_ref, w2_ref, wb2_ref, prm_ref, out_ref,
               *, n_img, p1_pix):
    out_ref[...] = _saf_compute(
        x_ref[...], res_ref[...], p1_ref[...], p2_ref[...],
        bdn_ref[...], bup_ref[...],
        w1_ref[...], wb1_ref[...], w2_ref[...], wb2_ref[...], prm_ref[...],
        n_img=n_img, p1_pix=p1_pix, in_kernel=True)


# ------------------------------- glue ----------------------------------

def _im2col_lane(x_nchw, k, stride, pad):
    """im2col producing a lane-batched (C*k*k, N*Ho*Wo) patch slab.

    Patch-row order is (c_in, kh, kw), matching a (C_out, C_in*k*k) weight.
    # TODO(synk): at production HRNet sizes this 9x HBM blow-up should move
    # into the kernel (9 shifted matmuls on a lane-dense (C, H*W) slab with
    # boundary masks) instead of wrapper-side im2col."""
    n, c, h, w = x_nchw.shape
    xp = jnp.pad(x_nchw, ((0, 0), (0, 0), (pad, pad), (pad, pad)))
    ho = (h + 2 * pad - k) // stride + 1
    wo = (w + 2 * pad - k) // stride + 1
    cols = []
    for dh in range(k):
        for dw in range(k):
            cols.append(xp[:, :, dh:dh + stride * ho:stride,
                           dw:dw + stride * wo:stride])
    pat = jnp.stack(cols, axis=2)                      # (N, C, k*k, Ho, Wo)
    pat = pat.reshape(n, c * k * k, ho * wo)           # (N, C*k*k, P)
    pat = jnp.transpose(pat, (1, 0, 2)).reshape(c * k * k, n * ho * wo)
    return pat, ho, wo


def _bilinear_matrix(out_size, in_size):
    # Matches F.interpolate(mode='bilinear', align_corners=False).
    scale = in_size / out_size
    m = np.zeros((out_size, in_size), np.float32)
    for i in range(out_size):
        src = max(scale * (i + 0.5) - 0.5, 0.0)
        i0 = min(int(np.floor(src)), in_size - 1)
        i1 = min(i0 + 1, in_size - 1)
        l1 = src - i0
        m[i, i0] += 1.0 - l1
        m[i, i1] += l1
    return m


@functools.lru_cache(maxsize=None)
def _resize_mats_np(n, h, w, h2, w2):
    """Batch-folded bilinear resize matrices, built & cached as NumPy ONLY
    (caching jnp arrays here is what leaked tracers out of jit previously).

    bdn = kron(I_N, Mdn^T): (N*HW, N*P2), applied as res(C, N*HW) @ bdn.
    bup = kron(I_N, Mup^T): (N*P2, N*HW), applied as y(C, N*P2) @ bup."""
    mdn = np.kron(_bilinear_matrix(h2, h), _bilinear_matrix(w2, w))  # (P2, HW)
    mup = np.kron(_bilinear_matrix(h, h2), _bilinear_matrix(w, w2))  # (HW, P2)
    eye = np.eye(n, dtype=np.float32)
    bdn = np.kron(eye, np.ascontiguousarray(mdn.T))   # (N*HW, N*P2)
    bup = np.kron(eye, np.ascontiguousarray(mup.T))   # (N*P2, N*HW)
    return bdn, bup


def _prepare_inputs(x_nchw, res_nchw, params):
    n, c, h, w = x_nchw.shape
    bf16 = jnp.bfloat16
    x4 = x_nchw.astype(jnp.float32)
    r4 = res_nchw.astype(jnp.float32)

    p1, h1, w1_ = _im2col_lane(x4, 3, 1, 0)   # R1: 3x3, stride 1, pad 0 (on x)
    p2, h2, w2_ = _im2col_lane(r4, 3, 2, 1)   # R2: 3x3, stride 2, pad 1 (on res)
    bdn_np, bup_np = _resize_mats_np(n, h, w, h2, w2_)

    # Fold batch into the lane (pixel) axis: (N, C, P) -> (C, N*P).
    def lanes(a):
        return jnp.transpose(a, (1, 0, 2)).reshape(a.shape[1], n * a.shape[2])

    args = (lanes(x4.reshape(n, c, h * w)), lanes(r4.reshape(n, c, h * w)),
            p1.astype(bf16), p2.astype(bf16),
            jnp.asarray(bdn_np, bf16), jnp.asarray(bup_np, bf16),
            params["w1"].astype(bf16), params["wb1"].astype(bf16),
            params["w2"].astype(bf16), params["wb2"].astype(bf16),
            params["prm"])
    meta = dict(n=n, c=c, h=h, w=w, p1_pix=h1 * w1_)
    return args, meta


@jax.jit
def saf_forward_pallas(x_nchw, res_nchw, params):
    args, m = _prepare_inputs(x_nchw, res_nchw, params)
    n, c, h, w = m["n"], m["c"], m["h"], m["w"]
    vmem = pl.BlockSpec(memory_space=pltpu.MemorySpace.VMEM)
    kern = functools.partial(saf_kernel, n_img=n, p1_pix=m["p1_pix"])
    # Whole problem (< ~0.5 MiB of operands) stays resident in VMEM; no grid.
    out = pl.pallas_call(
        kern,
        out_shape=jax.ShapeDtypeStruct((c, n * h * w), jnp.float32),
        in_specs=[vmem] * len(args),
        out_specs=vmem,
        compiler_params=pltpu.CompilerParams(vmem_limit_bytes=32 * 1024 * 1024),
    )(*args)
    # (C, N*HW) -> (N, C, H, W): cheap wrapper-side un-fold of the batch axis.
    return jnp.transpose(out.reshape(c, n, h, w), (1, 0, 2, 3))


def saf_forward_ref(x_nchw, res_nchw, params):
    args, m = _prepare_inputs(x_nchw, res_nchw, params)
    out = _saf_compute(*args, n_img=m["n"], p1_pix=m["p1_pix"], in_kernel=False)
    return jnp.transpose(out.reshape(m["c"], m["n"], m["h"], m["w"]),
                         (1, 0, 2, 3))


def init_params(channels, key):
    c = channels
    k = jax.random.split(key, 6)
    w1 = 0.1 * jax.random.normal(k[0], (c, 9 * c), jnp.float32)   # R1 3x3 conv
    wb1 = 0.1 * jax.random.normal(k[1], (c, c), jnp.float32)      # B1 1x1 conv
    w2 = 0.1 * jax.random.normal(k[2], (c, 9 * c), jnp.float32)   # R2 3x3 conv
    wb2 = 0.1 * jax.random.normal(k[3], (c, c), jnp.float32)      # B2 1x1 conv
    gammas = 1.0 + 0.1 * jax.random.normal(k[4], (4, c), jnp.float32)
    betas = 0.05 * jax.random.normal(k[5], (4, c), jnp.float32)
    # Conv biases are intentionally omitted: training-mode BN cancels them.
    # prm columns: [g1, be1, gb1, beb1, g2, be2, gb2, beb2], shaped (C, 8).
    prm = jnp.stack([gammas[0], betas[0], gammas[1], betas[1],
                     gammas[2], betas[2], gammas[3], betas[3]], axis=1)
    return {"w1": w1, "wb1": wb1, "w2": w2, "wb2": wb2, "prm": prm}


if __name__ == "__main__":
    key = jax.random.PRNGKey(0)
    kx, kr, kp = jax.random.split(key, 3)
    N, C, H, W = 2, 4, 16, 16
    x = jax.random.normal(kx, (N, C, H, W), jnp.float32)
    residual = jax.random.normal(kr, (N, C, H, W), jnp.float32)
    params = init_params(C, kp)

    out = jax.block_until_ready(saf_forward_pallas(x, residual, params))
    assert out.shape == (N, C, H, W)
    assert bool(jnp.all(jnp.isfinite(out)))

    ref = jax.block_until_ready(saf_forward_ref(x, residual, params))
    assert bool(jnp.allclose(out, ref, rtol=1e-2, atol=1e-2))

    print("KERNEL_OK")
</pallas_src>

<mosaic_0001>
module attributes {stable_mosaic.version = 11 : i64} {
  func.func @saf_kernel(%arg0: memref<4x512xf32, #tpu.memory_space<vmem>>, %arg1: memref<4x512xf32, #tpu.memory_space<vmem>>, %arg2: memref<36x392xbf16, #tpu.memory_space<vmem>>, %arg3: memref<36x128xbf16, #tpu.memory_space<vmem>>, %arg4: memref<512x128xbf16, #tpu.memory_space<vmem>>, %arg5: memref<128x512xbf16, #tpu.memory_space<vmem>>, %arg6: memref<4x36xbf16, #tpu.memory_space<vmem>>, %arg7: memref<4x4xbf16, #tpu.memory_space<vmem>>, %arg8: memref<4x36xbf16, #tpu.memory_space<vmem>>, %arg9: memref<4x4xbf16, #tpu.memory_space<vmem>>, %arg10: memref<4x8xf32, #tpu.memory_space<vmem>>, %arg11: memref<4x512xf32, #tpu.memory_space<vmem>>) attributes {dimension_semantics = [], scalar_prefetch = 0 : i64, scratch_operands = 0 : i64, tpu.core_type = #tpu.core_type<tc>} {
    %c0 = arith.constant 0 : index
    %c0_0 = arith.constant 0 : index
    %0 = vector.load %arg0[%c0, %c0_0] : memref<4x512xf32, #tpu.memory_space<vmem>>, vector<4x512xf32>
    %c0_1 = arith.constant 0 : index
    %c0_2 = arith.constant 0 : index
    %1 = vector.load %arg1[%c0_1, %c0_2] : memref<4x512xf32, #tpu.memory_space<vmem>>, vector<4x512xf32>
    %c0_3 = arith.constant 0 : index
    %c0_4 = arith.constant 0 : index
    %2 = vector.load %arg2[%c0_3, %c0_4] : memref<36x392xbf16, #tpu.memory_space<vmem>>, vector<36x392xbf16>
    %c0_5 = arith.constant 0 : index
    %c0_6 = arith.constant 0 : index
    %3 = vector.load %arg3[%c0_5, %c0_6] : memref<36x128xbf16, #tpu.memory_space<vmem>>, vector<36x128xbf16>
    %c0_7 = arith.constant 0 : index
    %c0_8 = arith.constant 0 : index
    %4 = vector.load %arg4[%c0_7, %c0_8] : memref<512x128xbf16, #tpu.memory_space<vmem>>, vector<512x128xbf16>
    %c0_9 = arith.constant 0 : index
    %c0_10 = arith.constant 0 : index
    %5 = vector.load %arg5[%c0_9, %c0_10] : memref<128x512xbf16, #tpu.memory_space<vmem>>, vector<128x512xbf16>
    %c0_11 = arith.constant 0 : index
    %c0_12 = arith.constant 0 : index
    %6 = vector.load %arg6[%c0_11, %c0_12] : memref<4x36xbf16, #tpu.memory_space<vmem>>, vector<4x36xbf16>
    %c0_13 = arith.constant 0 : index
    %c0_14 = arith.constant 0 : index
    %7 = vector.load %arg7[%c0_13, %c0_14] : memref<4x4xbf16, #tpu.memory_space<vmem>>, vector<4x4xbf16>
    %c0_15 = arith.constant 0 : index
    %c0_16 = arith.constant 0 : index
    %8 = vector.load %arg8[%c0_15, %c0_16] : memref<4x36xbf16, #tpu.memory_space<vmem>>, vector<4x36xbf16>
    %c0_17 = arith.constant 0 : index
    %c0_18 = arith.constant 0 : index
    %9 = vector.load %arg9[%c0_17, %c0_18] : memref<4x4xbf16, #tpu.memory_space<vmem>>, vector<4x4xbf16>
    %c0_19 = arith.constant 0 : index
    %c0_20 = arith.constant 0 : index
    %10 = vector.load %arg10[%c0_19, %c0_20] : memref<4x8xf32, #tpu.memory_space<vmem>>, vector<4x8xf32>
    %11 = vector.extract_strided_slice %10 {offsets = [0, 0], sizes = [4, 1], strides = [1, 1]} : vector<4x8xf32> to vector<4x1xf32>
    %12 = vector.extract_strided_slice %10 {offsets = [0, 1], sizes = [4, 1], strides = [1, 1]} : vector<4x8xf32> to vector<4x1xf32>
    %13 = vector.extract_strided_slice %10 {offsets = [0, 2], sizes = [4, 1], strides = [1, 1]} : vector<4x8xf32> to vector<4x1xf32>
    %14 = vector.extract_strided_slice %10 {offsets = [0, 3], sizes = [4, 1], strides = [1, 1]} : vector<4x8xf32> to vector<4x1xf32>
    %15 = vector.extract_strided_slice %10 {offsets = [0, 4], sizes = [4, 1], strides = [1, 1]} : vector<4x8xf32> to vector<4x1xf32>
    %16 = vector.extract_strided_slice %10 {offsets = [0, 5], sizes = [4, 1], strides = [1, 1]} : vector<4x8xf32> to vector<4x1xf32>
    %17 = vector.extract_strided_slice %10 {offsets = [0, 6], sizes = [4, 1], strides = [1, 1]} : vector<4x8xf32> to vector<4x1xf32>
    %18 = vector.extract_strided_slice %10 {offsets = [0, 7], sizes = [4, 1], strides = [1, 1]} : vector<4x8xf32> to vector<4x1xf32>
    %cst = arith.constant dense<0.000000e+00> : vector<4x392xf32>
    %19 = tpu.matmul %6, %2, %cst {dimension_numbers = #tpu.dot_dimension_numbers<[1], [0], [0], [1], [0, 0, 1, 1], [], []>} : vector<4x36xbf16>, vector<36x392xbf16>, vector<4x392xf32> -> vector<4x392xf32>
    %cst_21 = arith.constant dense<0.000000e+00> : vector<4xf32>
    %20 = vector.multi_reduction <add>, %19, %cst_21 [1] : vector<4x392xf32> to vector<4xf32>
    %21 = vector.shape_cast %20 : vector<4xf32> to vector<4x1xf32>
    %cst_22 = arith.constant 3.920000e+02 : f32
    %22 = vector.broadcast %cst_22 : f32 to vector<4x1xf32>
    %23 = arith.divf %21, %22 : vector<4x1xf32>
    %24 = arith.mulf %19, %19 : vector<4x392xf32>
    %cst_23 = arith.constant dense<0.000000e+00> : vector<4xf32>
    %25 = vector.multi_reduction <add>, %24, %cst_23 [1] : vector<4x392xf32> to vector<4xf32>
    %26 = vector.shape_cast %25 : vector<4xf32> to vector<4x1xf32>
    %cst_24 = arith.constant 3.920000e+02 : f32
    %27 = vector.broadcast %cst_24 : f32 to vector<4x1xf32>
    %28 = arith.divf %26, %27 : vector<4x1xf32>
    %29 = arith.mulf %23, %23 : vector<4x1xf32>
    %30 = arith.subf %28, %29 : vector<4x1xf32>
    %cst_25 = arith.constant 9.99999974E-6 : f32
    %31 = vector.broadcast %cst_25 : f32 to vector<4x1xf32>
    %32 = arith.addf %30, %31 : vector<4x1xf32>
    %33 = math.rsqrt %32 : vector<4x1xf32>
    %34 = arith.mulf %11, %33 : vector<4x1xf32>
    %35 = arith.mulf %23, %34 : vector<4x1xf32>
    %36 = arith.subf %12, %35 : vector<4x1xf32>
    %37 = vector.broadcast %34 : vector<4x1xf32> to vector<4x392xf32>
    %38 = arith.mulf %19, %37 : vector<4x392xf32>
    %39 = vector.broadcast %36 : vector<4x1xf32> to vector<4x392xf32>
    %40 = arith.addf %38, %39 : vector<4x392xf32>
    %cst_26 = arith.constant 0.000000e+00 : f32
    %41 = vector.broadcast %cst_26 : f32 to vector<4x392xf32>
    %42 = arith.maximumf %40, %41 : vector<4x392xf32>
    %43 = tpu.iota {dimensions = array<i32: 1>} : vector<1x392xi32>
    %44 = tpu.iota {dimensions = array<i32: 1>} : vector<1x512xi32>
    %cst_27 = arith.constant 0.000000e+00 : f32
    %45 = vector.broadcast %cst_27 : f32 to vector<4x512xf32>
    %c0_i32 = arith.constant 0 : i32
    %46 = vector.broadcast %c0_i32 : i32 to vector<1x392xi32>
    %47 = arith.cmpi sge, %43, %46 : vector<1x392xi32>
    %c196_i32 = arith.constant 196 : i32
    %48 = vector.broadcast %c196_i32 : i32 to vector<1x392xi32>
    %49 = arith.cmpi slt, %43, %48 : vector<1x392xi32>
    %50 = arith.andi %47, %49 : vector<1x392xi1>
    %51 = arith.extui %50 : vector<1x392xi1> to vector<1x392xi32>
    %52 = arith.sitofp %51 : vector<1x392xi32> to vector<1x392xf32>
    %c0_i32_28 = arith.constant 0 : i32
    %53 = vector.broadcast %c0_i32_28 : i32 to vector<1x512xi32>
    %54 = arith.cmpi sge, %44, %53 : vector<1x512xi32>
    %c256_i32 = arith.constant 256 : i32
    %55 = vector.broadcast %c256_i32 : i32 to vector<1x512xi32>
    %56 = arith.cmpi slt, %44, %55 : vector<1x512xi32>
    %57 = arith.andi %54, %56 : vector<1x512xi1>
    %58 = arith.extui %57 : vector<1x512xi1> to vector<1x512xi32>
    %59 = arith.sitofp %58 : vector<1x512xi32> to vector<1x512xf32>
    %60 = vector.broadcast %52 : vector<1x392xf32> to vector<4x392xf32>
    %61 = arith.mulf %60, %42 : vector<4x392xf32>
    %cst_29 = arith.constant dense<0.000000e+00> : vector<4xf32>
    %62 = vector.multi_reduction <add>, %61, %cst_29 [1] : vector<4x392xf32> to vector<4xf32>
    %63 = vector.shape_cast %62 : vector<4xf32> to vector<4x1xf32>
    %cst_30 = arith.constant 0.00510204071 : f32
    %64 = vector.broadcast %cst_30 : f32 to vector<4x1xf32>
    %65 = arith.mulf %63, %64 : vector<4x1xf32>
    %66 = vector.broadcast %59 : vector<1x512xf32> to vector<4x512xf32>
    %67 = vector.broadcast %65 : vector<4x1xf32> to vector<4x512xf32>
    %68 = arith.mulf %66, %67 : vector<4x512xf32>
    %69 = arith.addf %45, %68 : vector<4x512xf32>
    %c196_i32_31 = arith.constant 196 : i32
    %70 = vector.broadcast %c196_i32_31 : i32 to vector<1x392xi32>
    %71 = arith.cmpi sge, %43, %70 : vector<1x392xi32>
    %c392_i32 = arith.constant 392 : i32
    %72 = vector.broadcast %c392_i32 : i32 to vector<1x392xi32>
    %73 = arith.cmpi slt, %43, %72 : vector<1x392xi32>
    %74 = arith.andi %71, %73 : vector<1x392xi1>
    %75 = arith.extui %74 : vector<1x392xi1> to vector<1x392xi32>
    %76 = arith.sitofp %75 : vector<1x392xi32> to vector<1x392xf32>
    %c256_i32_32 = arith.constant 256 : i32
    %77 = vector.broadcast %c256_i32_32 : i32 to vector<1x512xi32>
    %78 = arith.cmpi sge, %44, %77 : vector<1x512xi32>
    %c512_i32 = arith.constant 512 : i32
    %79 = vector.broadcast %c512_i32 : i32 to vector<1x512xi32>
    %80 = arith.cmpi slt, %44, %79 : vector<1x512xi32>
    %81 = arith.andi %78, %80 : vector<1x512xi1>
    %82 = arith.extui %81 : vector<1x512xi1> to vector<1x512xi32>
    %83 = arith.sitofp %82 : vector<1x512xi32> to vector<1x512xf32>
    %84 = vector.broadcast %76 : vector<1x392xf32> to vector<4x392xf32>
    %85 = arith.mulf %84, %42 : vector<4x392xf32>
    %cst_33 = arith.constant dense<0.000000e+00> : vector<4xf32>
    %86 = vector.multi_reduction <add>, %85, %cst_33 [1] : vector<4x392xf32> to vector<4xf32>
    %87 = vector.shape_cast %86 : vector<4xf32> to vector<4x1xf32>
    %cst_34 = arith.constant 0.00510204071 : f32
    %88 = vector.broadcast %cst_34 : f32 to vector<4x1xf32>
    %89 = arith.mulf %87, %88 : vector<4x1xf32>
    %90 = vector.broadcast %83 : vector<1x512xf32> to vector<4x512xf32>
    %91 = vector.broadcast %89 : vector<4x1xf32> to vector<4x512xf32>
    %92 = arith.mulf %90, %91 : vector<4x512xf32>
    %93 = arith.addf %69, %92 : vector<4x512xf32>
    %94 = arith.addf %0, %93 : vector<4x512xf32>
    %95 = arith.truncf %94 : vector<4x512xf32> to vector<4x512xbf16>
    %cst_35 = arith.constant dense<0.000000e+00> : vector<4x512xf32>
    %96 = tpu.matmul %7, %95, %cst_35 {dimension_numbers = #tpu.dot_dimension_numbers<[1], [0], [0], [1], [0, 0, 1, 1], [], []>} : vector<4x4xbf16>, vector<4x512xbf16>, vector<4x512xf32> -> vector<4x512xf32>
    %cst_36 = arith.constant dense<0.000000e+00> : vector<4xf32>
    %97 = vector.multi_reduction <add>, %96, %cst_36 [1] : vector<4x512xf32> to vector<4xf32>
    %98 = vector.shape_cast %97 : vector<4xf32> to vector<4x1xf32>
    %cst_37 = arith.constant 5.120000e+02 : f32
    %99 = vector.broadcast %cst_37 : f32 to vector<4x1xf32>
    %100 = arith.divf %98, %99 : vector<4x1xf32>
    %101 = arith.mulf %96, %96 : vector<4x512xf32>
    %cst_38 = arith.constant dense<0.000000e+00> : vector<4xf32>
    %102 = vector.multi_reduction <add>, %101, %cst_38 [1] : vector<4x512xf32> to vector<4xf32>
    %103 = vector.shape_cast %102 : vector<4xf32> to vector<4x1xf32>
    %cst_39 = arith.constant 5.120000e+02 : f32
    %104 = vector.broadcast %cst_39 : f32 to vector<4x1xf32>
    %105 = arith.divf %103, %104 : vector<4x1xf32>
    %106 = arith.mulf %100, %100 : vector<4x1xf32>
    %107 = arith.subf %105, %106 : vector<4x1xf32>
    %cst_40 = arith.constant 9.99999974E-6 : f32
    %108 = vector.broadcast %cst_40 : f32 to vector<4x1xf32>
    %109 = arith.addf %107, %108 : vector<4x1xf32>
    %110 = math.rsqrt %109 : vector<4x1xf32>
    %111 = arith.mulf %13, %110 : vector<4x1xf32>
    %112 = arith.mulf %100, %111 : vector<4x1xf32>
    %113 = arith.subf %14, %112 : vector<4x1xf32>
    %114 = vector.broadcast %111 : vector<4x1xf32> to vector<4x512xf32>
    %115 = arith.mulf %96, %114 : vector<4x512xf32>
    %116 = vector.broadcast %113 : vector<4x1xf32> to vector<4x512xf32>
    %117 = arith.addf %115, %116 : vector<4x512xf32>
    %cst_41 = arith.constant dense<0.000000e+00> : vector<4x128xf32>
    %118 = tpu.matmul %8, %3, %cst_41 {dimension_numbers = #tpu.dot_dimension_numbers<[1], [0], [0], [1], [0, 0, 1, 1], [], []>} : vector<4x36xbf16>, vector<36x128xbf16>, vector<4x128xf32> -> vector<4x128xf32>
    %cst_42 = arith.constant dense<0.000000e+00> : vector<4xf32>
    %119 = vector.multi_reduction <add>, %118, %cst_42 [1] : vector<4x128xf32> to vector<4xf32>
    %120 = vector.shape_cast %119 : vector<4xf32> to vector<4x1xf32>
    %cst_43 = arith.constant 1.280000e+02 : f32
    %121 = vector.broadcast %cst_43 : f32 to vector<4x1xf32>
    %122 = arith.divf %120, %121 : vector<4x1xf32>
    %123 = arith.mulf %118, %118 : vector<4x128xf32>
    %cst_44 = arith.constant dense<0.000000e+00> : vector<4xf32>
    %124 = vector.multi_reduction <add>, %123, %cst_44 [1] : vector<4x128xf32> to vector<4xf32>
    %125 = vector.shape_cast %124 : vector<4xf32> to vector<4x1xf32>
    %cst_45 = arith.constant 1.280000e+02 : f32
    %126 = vector.broadcast %cst_45 : f32 to vector<4x1xf32>
    %127 = arith.divf %125, %126 : vector<4x1xf32>
    %128 = arith.mulf %122, %122 : vector<4x1xf32>
    %129 = arith.subf %127, %128 : vector<4x1xf32>
    %cst_46 = arith.constant 9.99999974E-6 : f32
    %130 = vector.broadcast %cst_46 : f32 to vector<4x1xf32>
    %131 = arith.addf %129, %130 : vector<4x1xf32>
    %132 = math.rsqrt %131 : vector<4x1xf32>
    %133 = arith.mulf %15, %132 : vector<4x1xf32>
    %134 = arith.mulf %122, %133 : vector<4x1xf32>
    %135 = arith.subf %16, %134 : vector<4x1xf32>
    %136 = vector.broadcast %133 : vector<4x1xf32> to vector<4x128xf32>
    %137 = arith.mulf %118, %136 : vector<4x128xf32>
    %138 = vector.broadcast %135 : vector<4x1xf32> to vector<4x128xf32>
    %139 = arith.addf %137, %138 : vector<4x128xf32>
    %cst_47 = arith.constant 0.000000e+00 : f32
    %140 = vector.broadcast %cst_47 : f32 to vector<4x128xf32>
    %141 = arith.maximumf %139, %140 : vector<4x128xf32>
    %142 = arith.truncf %1 : vector<4x512xf32> to vector<4x512xbf16>
    %cst_48 = arith.constant dense<0.000000e+00> : vector<4x128xf32>
    %143 = tpu.matmul %142, %4, %cst_48 {dimension_numbers = #tpu.dot_dimension_numbers<[1], [0], [0], [1], [0, 0, 1, 1], [], []>} : vector<4x512xbf16>, vector<512x128xbf16>, vector<4x128xf32> -> vector<4x128xf32>
    %144 = arith.addf %141, %143 : vector<4x128xf32>
    %145 = arith.truncf %144 : vector<4x128xf32> to vector<4x128xbf16>
    %cst_49 = arith.constant dense<0.000000e+00> : vector<4x128xf32>
    %146 = tpu.matmul %9, %145, %cst_49 {dimension_numbers = #tpu.dot_dimension_numbers<[1], [0], [0], [1], [0, 0, 1, 1], [], []>} : vector<4x4xbf16>, vector<4x128xbf16>, vector<4x128xf32> -> vector<4x128xf32>
    %cst_50 = arith.constant dense<0.000000e+00> : vector<4xf32>
    %147 = vector.multi_reduction <add>, %146, %cst_50 [1] : vector<4x128xf32> to vector<4xf32>
    %148 = vector.shape_cast %147 : vector<4xf32> to vector<4x1xf32>
    %cst_51 = arith.constant 1.280000e+02 : f32
    %149 = vector.broadcast %cst_51 : f32 to vector<4x1xf32>
    %150 = arith.divf %148, %149 : vector<4x1xf32>
    %151 = arith.mulf %146, %146 : vector<4x128xf32>
    %cst_52 = arith.constant dense<0.000000e+00> : vector<4xf32>
    %152 = vector.multi_reduction <add>, %151, %cst_52 [1] : vector<4x128xf32> to vector<4xf32>
    %153 = vector.shape_cast %152 : vector<4xf32> to vector<4x1xf32>
    %cst_53 = arith.constant 1.280000e+02 : f32
    %154 = vector.broadcast %cst_53 : f32 to vector<4x1xf32>
    %155 = arith.divf %153, %154 : vector<4x1xf32>
    %156 = arith.mulf %150, %150 : vector<4x1xf32>
    %157 = arith.subf %155, %156 : vector<4x1xf32>
    %cst_54 = arith.constant 9.99999974E-6 : f32
    %158 = vector.broadcast %cst_54 : f32 to vector<4x1xf32>
    %159 = arith.addf %157, %158 : vector<4x1xf32>
    %160 = math.rsqrt %159 : vector<4x1xf32>
    %161 = arith.mulf %17, %160 : vector<4x1xf32>
    %162 = arith.mulf %150, %161 : vector<4x1xf32>
    %163 = arith.subf %18, %162 : vector<4x1xf32>
    %164 = vector.broadcast %161 : vector<4x1xf32> to vector<4x128xf32>
    %165 = arith.mulf %146, %164 : vector<4x128xf32>
    %166 = vector.broadcast %163 : vector<4x1xf32> to vector<4x128xf32>
    %167 = arith.addf %165, %166 : vector<4x128xf32>
    %168 = arith.truncf %167 : vector<4x128xf32> to vector<4x128xbf16>
    %cst_55 = arith.constant dense<0.000000e+00> : vector<4x512xf32>
    %169 = tpu.matmul %168, %5, %cst_55 {dimension_numbers = #tpu.dot_dimension_numbers<[1], [0], [0], [1], [0, 0, 1, 1], [], []>} : vector<4x128xbf16>, vector<128x512xbf16>, vector<4x512xf32> -> vector<4x512xf32>
    %170 = arith.addf %117, %169 : vector<4x512xf32>
    %cst_56 = arith.constant 0.000000e+00 : f32
    %171 = vector.broadcast %cst_56 : f32 to vector<4x512xf32>
    %172 = arith.subf %171, %170 : vector<4x512xf32>
    %173 = math.exp %172 : vector<4x512xf32>
    %cst_57 = arith.constant 1.000000e+00 : f32
    %174 = vector.broadcast %cst_57 : f32 to vector<4x512xf32>
    %175 = arith.addf %174, %173 : vector<4x512xf32>
    %176 = tpu.reciprocal %175 {approx = true} : vector<4x512xf32> -> vector<4x512xf32>
    %177 = arith.subf %0, %1 : vector<4x512xf32>
    %178 = arith.mulf %177, %176 : vector<4x512xf32>
    %179 = arith.addf %1, %178 : vector<4x512xf32>
    %cst_58 = arith.constant 2.000000e+00 : f32
    %180 = vector.broadcast %cst_58 : f32 to vector<4x512xf32>
    %181 = arith.mulf %180, %179 : vector<4x512xf32>
    %cst_59 = arith.constant 0.000000e+00 : f32
    %182 = vector.broadcast %cst_59 : f32 to vector<4x512xf32>
    %183 = arith.subf %182, %181 : vector<4x512xf32>
    %184 = math.exp %183 : vector<4x512xf32>
    %cst_60 = arith.constant 1.000000e+00 : f32
    %185 = vector.broadcast %cst_60 : f32 to vector<4x512xf32>
    %186 = arith.addf %185, %184 : vector<4x512xf32>
    %187 = tpu.reciprocal %186 {approx = true} : vector<4x512xf32> -> vector<4x512xf32>
    %188 = arith.addf %0, %1 : vector<4x512xf32>
    %cst_61 = arith.constant 1.000000e+00 : f32
    %189 = vector.broadcast %cst_61 : f32 to vector<4x512xf32>
    %190 = arith.addf %189, %187 : vector<4x512xf32>
    %191 = arith.mulf %188, %190 : vector<4x512xf32>
    %c0_62 = arith.constant 0 : index
    %c0_63 = arith.constant 0 : index
    %192 = vector.load %arg11[%c0_62, %c0_63] : memref<4x512xf32, #tpu.memory_space<vmem>>, vector<4x512xf32>
    tpu.vector_store %arg11[%c0_62, %c0_63], %191 {strides = array<i32>} : memref<4x512xf32, #tpu.memory_space<vmem>>, vector<4x512xf32>,
    return
  }
}

</mosaic_0001>

<bundles_post_ra>
// kernel: saf_forward_pallas.1
= control target key start
LH: loop header
LB: loop body
LE: loop exit
PB: predicated region body
PF: predicated region fallthrough
CT: control target
= control target key end

     0   :  { %vm213_vm0 = vcmask 1041408   ;;  %vm209_vm1 = vcmask 293888   ;;  %vm278_vm2 = vcmask 1043456   ;;  %vm284_vm3 = vcmask 60416   ;;  %s1772_s17 = smov 1   ;;  %s2405_s2 = inlined_call_operand.vmem [shape: bf16[36,392], index: 2, kind: input, shape index: {}]   ;;  %s2406_s6 = inlined_call_operand.vmem [shape: bf16[4,36], index: 6, kind: input, shape index: {}]   ;;  %s2407_s10 = inlined_call_operand.vmem [shape: f32[4,8], index: 10, kind: input, shape index: {}]   ;;  %s2408_s0 = inlined_call_operand.vmem [shape: f32[4,512], index: 0, kind: input, shape index: {}]   ;;  %s2409_s3 = inlined_call_operand.vmem [shape: bf16[36,128], index: 3, kind: input, shape index: {}]   ;;  %s2410_s1 = inlined_call_operand.vmem [shape: f32[4,512], index: 1, kind: input, shape index: {}]   ;;  %s2411_s7 = inlined_call_operand.vmem [shape: bf16[4,4], index: 7, kind: input, shape index: {}]   ;;  %s2412_s8 = inlined_call_operand.vmem [shape: bf16[4,36], index: 8, kind: input, shape index: {}]   ;;  %s2413_s4 = inlined_call_operand.vmem [shape: bf16[512,128], index: 4, kind: input, shape index: {}]   ;;  %s2414_s9 = inlined_call_operand.vmem [shape: bf16[4,4], index: 9, kind: input, shape index: {}]   ;;  %s2415_s5 = inlined_call_operand.vmem [shape: bf16[128,512], index: 5, kind: input, shape index: {}]   ;;  %s2416_s11 = inlined_call_operand.vmem [shape: f32[4,512], index: 11, kind: output, shape index: {}]  }
   0x1   :  { %v51_v0 = vld [vmem:[%s2405_s2 + $0x40] sm:$0x33]  ;;  %v52_v1 = vld [vmem:[%s2405_s2 + $0x48] sm:$0x33]  ;;  %v1642_v7 = vld [vmem:[%s2405_s2 + $0x2c] sm:$0xf0] }
   0x2   :  { %v185_v2 = vunpack.c.l.b16 %v51_v0  ;;  %v186_v3 = vunpack.c.h.b16 %v51_v0  ;;  %v187_v4 = vunpack.c.l.b16 %v52_v1  ;;  %v188_v5 = vunpack.c.h.b16 %v52_v1  ;;  %v1345_v6 = vld [vmem:[%s2405_s2 + $0x20] sm:$0xf]  ;;  %v1640_v12 = vld [vmem:[%s2405_s2 + $0x24] sm:$0xf]  ;;  %v1347_v13 = vld [vmem:[%s2405_s2 + $0x30] sm:$0xf0] }
   0x3   :  { %v1353_v14 = vld [vmem:[%s2405_s2 + $0x28] sm:$0xf]  ;;  %v1643_v15 = vld [vmem:[%s2405_s2 + $0x34] sm:$0xf0]  ;;  %v1641_v16 = vld [vmem:[%s2405_s2 + $0x2c] sm:$0xf]  ;;  %v1346_v22 = vor.u32 %v1642_v7, %v1345_v6  ;;  %v1350_v23 = vor.u32 %v1640_v12, %v1347_v13 }
   0x4   :  { %v197_v8 = vpack.c.b16 %v185_v2, %v185_v2  ;;  %v198_v9 = vpack.c.b16 %v186_v3, %v186_v3  ;;  %v199_v10 = vpack.c.b16 %v187_v4, %v187_v4  ;;  %v200_v11 = vpack.c.b16 %v188_v5, %v188_v5  ;;  %v1355_v17 = vld [vmem:[%s2405_s2 + $0x38] sm:$0xf0]  ;;  %v1329_v24 = vld [vmem:[%s2405_s2] sm:$0xf]  ;;  %v1638_v25 = vld [vmem:[%s2405_s2 + $0xc] sm:$0xf0] }
   0x5   :  { %v1354_v26 = vor.u32 %v1643_v15, %v1353_v14  ;;  %v1358_v27 = vor.u32 %v1641_v16, %v1355_v17  ;;  %v1636_v28 = vld [vmem:[%s2405_s2 + $0x4] sm:$0xf]  ;;  %v1331_v29 = vld [vmem:[%s2405_s2 + $0x10] sm:$0xf0]  ;;  %v1337_v30 = vld [vmem:[%s2405_s2 + $0x8] sm:$0xf]  ;;  %v1330_v34 = vor.u32 %v1638_v25, %v1329_v24 }
   0x6   :  { %v215_v18 = vsel %vm213_vm0, %v197_v8, 0  ;;  %v218_v19 = vsel %vm213_vm0, %v198_v9, 0  ;;  %v221_v20 = vsel %vm213_vm0, %v199_v10, 0  ;;  %v224_v21 = vsel %vm213_vm0, %v200_v11, 0  ;;  %v1639_v31 = vld [vmem:[%s2405_s2 + $0x14] sm:$0xf0] }
   0x7   :  { %231 = vmatpush.bf16.msra.mxu0 %v215_v18  ;;  %244 = vmatpush.bf16.msra.mxu1 %v218_v19  ;;  %v1637_v32 = vld [vmem:[%s2405_s2 + $0xc] sm:$0xf]  ;;  %v1339_v33 = vld [vmem:[%s2405_s2 + $0x18] sm:$0xf0]  ;;  %v1334_v35 = vor.u32 %v1636_v28, %v1331_v29  ;;  %v1338_v36 = vor.u32 %v1639_v31, %v1337_v30  ;;  %v154_v38 = vld [vmem:[%s2406_s6] sm:$0x3]  ;;  %v353_v29 = vlaneseq }
   0x8   :  { %257 = vmatpush.bf16.msra.mxu2 %v221_v20  ;;  %270 = vmatpush.bf16.msra.mxu3 %v224_v21  ;;  %v1342_v37 = vor.u32 %v1637_v32, %v1339_v33  ;;  %v1770_v1 = vmov 392.0   ;;  %v1771_v10 = vmov 0   ;;  %v1939_v21 = vld [vmem:[%s2407_s10] sm:$0xf]  ;;  %vm507_vm11 = vcmask 31744  }
   0x9   :  { %1732 = vrcp.f32 %v1770_v1  ;;  %1723 = vset.pattern.permute.xlu1 %v1771_v10  ;;  %v354_v30 = vand.u32 127, %v353_v29 }
   0xb   :  { %232 = vmatpush.bf16.msra.mxu0 %v1346_v22  ;;  %245 = vmatpush.bf16.msra.mxu1 %v1350_v23  ;;  %v355_v32 = vadd.s32 128, %v354_v30  ;;  %v357_v33 = vadd.s32 384, %v354_v30 }
   0xc   :  { %258 = vmatpush.bf16.msra.mxu2 %v1354_v26  ;;  %271 = vmatpush.bf16.msra.mxu3 %v1358_v27  ;;  %v1773_v26 = vmov 1  }
   0xd   :  { %1724 = vset.pattern.permute.xlu2 %v1773_v26  ;;  %vm417_vm8 = vcmp.ge.s32.totalorder %v355_v32, 196  ;;  %vm363_vm9 = vcmp.lt.s32.totalorder %v355_v32, 196  ;;  %vm423_vm10 = vcmp.lt.s32.totalorder %v357_v33, 392  ;;  %v1976_v26 = vld [vmem:[%s2410_s1] sm:$0xff] }
   0xf   :  { %233 = vmatpush.bf16.msra.mxu0 %v1330_v34  ;;  %246 = vmatpush.bf16.msra.mxu1 %v1334_v35  ;;  %v1733_v2 = vpop.eup %1732 }
  0x10   :  { %259 = vmatpush.bf16.msra.mxu2 %v1338_v36  ;;  %272 = vmatpush.bf16.msra.mxu3 %v1342_v37  ;;  %v290_v3 = vmul.f32 392.0, %v1733_v2  ;;  %vm294_vm4 = vweird.f32 %v1733_v2 }
  0x12   :  { %1359 = vmatmul.msk.bf16.vlgmr.msra.gmra.mxu0 %vm209_vm1, %v154_v38  ;;  %1360 = vmatmul.msk.bf16.vlgmr.msra.gmra.mxu1 %vm209_vm1, %v154_v38  ;;  %v291_v4 = vsub.f32 1.0, %v290_v3 }
  0x13   :  { %1361 = vmatmul.msk.bf16.vlgmr.msra.gmra.mxu2 %vm209_vm1, %v154_v38  ;;  %1362 = vmatmul.msk.bf16.vlgmr.msra.gmra.mxu3 %vm209_vm1, %v154_v38 }
  0x14   :  { %v292_v5 = vmul.f32 %v1733_v2, %v291_v4 }
  0x16   :  { %v293_v6 = vadd.f32 %v1733_v2, %v292_v5 }
  0x18   :  { %v295_v8 = vsel %vm294_vm4, %v1733_v2, %v293_v6 }
  0x8f   :  { %v1908_v39 = vpop.f32.mrf.mxu0  ;;  %v1910_v40 = vpop.f32.mrf.mxu1 }
  0x90   :  { %v279_v41 = vsel %vm278_vm2, %v1908_v39, 0.0  ;;  %v280_v42 = vsel %vm278_vm2, %v1910_v40, 0.0  ;;  %v297_v43 = vmul.f32 %v1908_v39, %v1908_v39  ;;  %v298_v44 = vmul.f32 %v1910_v40, %v1910_v40 }
  0x91   :  { %v281_v45 = vadd.f32 %v280_v42, %v279_v41 }
  0x92   :  { %v301_v46 = vsel %vm278_vm2, %v297_v43, 0.0  ;;  %v302_v49 = vsel %vm278_vm2, %v298_v44, 0.0 }
  0x93   :  { %v303_v57 = vadd.f32 %v302_v49, %v301_v46 }
  0x96   :  { %v1921_v47 = vpop.f32.mrf.mxu2  ;;  %v1923_v48 = vpop.f32.mrf.mxu3 }
  0x97   :  { %v299_v50 = vmul.f32 %v1921_v47, %v1921_v47  ;;  %v237_v51 = vpop.f32.mrf.mxu0  ;;  %v250_v52 = vpop.f32.mrf.mxu1  ;;  %v282_v53 = vsel %vm278_vm2, %v1921_v47, 0.0  ;;  %v285_v54 = vsel %vm284_vm3, %v1923_v48, 0.0  ;;  %v300_v58 = vmul.f32 %v1923_v48, %v1923_v48 }
  0x98   :  { %v283_v55 = vadd.f32 %v282_v53, %v281_v45  ;;  %v1774_v45 = vmov 0.0  }
  0x99   :  { %v304_v59 = vsel %vm278_vm2, %v299_v50, 0.0  ;;  %v306_v63 = vsel %vm284_vm3, %v300_v58, 0.0  ;;  %v1364_v46 = vsel %vm417_vm8, 1.0, %v1774_v45  ;;  %v1363_v49 = vsel %vm363_vm9, 1.0, %v1774_v45 }
  0x9a   :  { %v286_v56 = vadd.f32 %v285_v54, %v283_v55  ;;  %v305_v62 = vadd.f32 %v304_v59, %v303_v57 }
  0x9c   :  { %287 = vadd.xlane.f32.xlu0 %v286_v56  ;;  %v307_v0 = vadd.f32 %v306_v63, %v305_v62 }
  0x9e   :  { %v263_v60 = vpop.f32.mrf.mxu2  ;;  %v276_v61 = vpop.f32.mrf.mxu3 }
  0xa4   :  { %308 = vadd.xlane.f32.xlu0 %v307_v0 }
 0x10f   :  { %v288_v7 = vpop.xlane.xlu0 %287 }
 0x110   :  { %v296_v9 = vmul.f32 %v295_v8, %v288_v7 }
 0x112   :  { %v311_v12 = vmul.f32 %v296_v9, %v296_v9 }
 0x117   :  { %v309_v11 = vpop.xlane.xlu0 %308 }
 0x118   :  { %v310_v13 = vmul.f32 %v309_v11, %v295_v8 }
 0x11a   :  { %v312_v14 = vsub.f32 %v310_v13, %v311_v12 }
 0x11c   :  { %v313_v15 = vadd.f32 1e-05, %v312_v14 }
 0x11e   :  { %1734 = vrsqrt.f32 %v313_v15  ;;  %vm320_vm6 = vweird.f32 %v313_v15 }
 0x124   :  { %v1735_v16 = vpop.eup %1734 }
 0x125   :  { %v315_v17 = vmul.f32 %v1735_v16, %v313_v15  ;;  %vm321_vm5 = vweird.f32 %v1735_v16  ;;  %v1959_v15 = vld [vmem:[%s2408_s0] sm:$0xff] }
 0x126   :  { %vm322_vm7 = vmor %vm320_vm6, %vm321_vm5 }
 0x127   :  { %v316_v18 = vmul.f32 %v1735_v16, %v315_v17  ;;  %v1964_v17 = vld [vmem:[%s2408_s0 + $0x8] sm:$0xff] }
 0x129   :  { %v317_v19 = vmul.f32 0.5, %v316_v18 }
 0x12b   :  { %v318_v20 = vsub.f32 1.5, %v317_v19 }
 0x12d   :  { %v319_v22 = vmul.f32 %v1735_v16, %v318_v20 }
 0x12f   :  { %v323_v23 = vsel %vm322_vm7, %v1735_v16, %v319_v22 }
 0x130   :  { %v324_v24 = vmul.f32 %v323_v23, %v1939_v21  ;;  %v57_v23 = vld [vmem:[%s2409_s3 + $0x10] sm:$0x3] }
 0x132   :  { %v325_v25 = vmul.f32 %v324_v24, %v296_v9 }
 0x134   :  { %327 = vrot.lane.b32.xlu1 %v325_v25, %s1772_s17  ;;  %v653_v25 = vunpack.c.l.b16 %v57_v23 }
 0x13c   :  { %333 = vperm.xlu1 %1723, %v324_v24  }
 0x1a6   :  { %v328_v27 = vpop.permute.xlu1 %327 }
 0x1a7   :  { %v330_v28 = vsub.f32 %v1939_v21, %v328_v27  ;;  %v656_v27 = vpack.c.b16 %v653_v25, %v653_v25  ;;  %v1658_v25 = vld [vmem:[%s2413_s4 + $0x60] sm:$0xff] }
 0x1a9   :  { %342 = vperm.xlu2 %1724, %v330_v28   ;;  %v1981_v28 = vld [vmem:[%s2410_s1 + $0x8] sm:$0xff] }
 0x1ae   :  { %v334_v31 = vpop.permute.xlu1 %333 }
 0x1af   :  { %v336_v34 = vmul.f32 %v334_v31, %v1908_v39  ;;  %v337_v35 = vmul.f32 %v334_v31, %v1910_v40  ;;  %v338_v36 = vmul.f32 %v334_v31, %v1921_v47  ;;  %v339_v37 = vmul.f32 %v334_v31, %v1923_v48 }
 0x1b0   :  { %v1365_v40 = vsel %vm423_vm10, 1.0, %v1774_v45  ;;  %v1645_v45 = vld [vmem:[%s2409_s3 + $0x8] sm:$0xff] }
 0x203   :  { %v343_v38 = vpop.permute.xlu2 %342 }
 0x204   :  { %v345_v41 = vadd.f32 %v343_v38, %v336_v34  ;;  %v346_v42 = vadd.f32 %v343_v38, %v337_v35  ;;  %v347_v43 = vadd.f32 %v343_v38, %v338_v36  ;;  %v348_v44 = vadd.f32 %v343_v38, %v339_v37 }
 0x205   :  { %v663_v36 = vsel %vm213_vm0, %v656_v27, 0  ;;  %v1666_v27 = vld [vmem:[%s2413_s4 + $0xa0] sm:$0xff] }
 0x206   :  { %v349_v50 = vmax.f32 %v345_v41, 0.0  ;;  %v350_v51 = vmax.f32 %v346_v42, 0.0  ;;  %v351_v39 = vmax.f32 %v347_v43, 0.0  ;;  %v352_v52 = vmax.f32 %v348_v44, 0.0  ;;  %v155_v43 = vld [vmem:[%s2411_s7] sm:$0x3] }
 0x208   :  { %v456_v53 = vmul.f32 0.0, %v349_v50  ;;  %v457_v47 = vmul.f32 %v1364_v46, %v350_v51  ;;  %v395_v54 = vmul.f32 %v1363_v49, %v350_v51  ;;  %v396_v48 = vmul.f32 0.0, %v351_v39  ;;  %v1644_v46 = vld [vmem:[%s2409_s3] sm:$0xff] }
 0x209   :  { %v459_v55 = vmul.f32 %v1365_v40, %v352_v52  ;;  %v397_v59 = vmul.f32 0.0, %v352_v52  ;;  %v398_v60 = vsel %vm278_vm2, %v349_v50, 0.0  ;;  %v463_v62 = vsel %vm278_vm2, %v351_v39, 0.0  ;;  %v156_v49 = vld [vmem:[%s2412_s8] sm:$0x3] }
 0x20a   :  { %v460_v56 = vsel %vm278_vm2, %v456_v53, 0.0  ;;  %v461_v57 = vsel %vm278_vm2, %v457_v47, 0.0  ;;  %v399_v61 = vsel %vm278_vm2, %v395_v54, 0.0  ;;  %v401_v1 = vsel %vm278_vm2, %v396_v48, 0.0 }
 0x20b   :  { %v462_v58 = vadd.f32 %v461_v57, %v460_v56  ;;  %v400_v63 = vadd.f32 %v399_v61, %v398_v60  ;;  %v465_v2 = vsel %vm284_vm3, %v459_v55, 0.0  ;;  %v403_v5 = vsel %vm284_vm3, %v397_v59, 0.0 }
 0x20c   :  { %v1775_v59 = vmov 128.0  }
 0x20d   :  { %v464_v0 = vadd.f32 %v463_v62, %v462_v58  ;;  %v402_v3 = vadd.f32 %v401_v1, %v400_v63  ;;  %1736 = vrcp.f32 %v1775_v59 }
 0x20f   :  { %v466_v4 = vadd.f32 %v465_v2, %v464_v0  ;;  %v404_v6 = vadd.f32 %v403_v5, %v402_v3  ;;  %v1776_v0 = vmov 4   ;;  %v1661_v3 = vld [vmem:[%s2413_s4 + $0x78] sm:$0xff] }
 0x210   :  { %1725 = vset.pattern.permute.xlu2 %v1776_v0  ;;  %v1671_v0 = vld [vmem:[%s2413_s4 + $0xc8] sm:$0xff] }
 0x211   :  { %467 = vadd.xlane.f32.xlu2 %v466_v4  ;;  %405 = vadd.xlane.f32.xlu0 %v404_v6  ;;  %v1669_v4 = vld [vmem:[%s2413_s4 + $0xb8] sm:$0xff] }
 0x212   :  { %v1653_v6 = vld [vmem:[%s2413_s4 + $0x38] sm:$0xff] }
 0x213   :  { %v1737_v60 = vpop.eup %1736 }
 0x214   :  { %v682_v61 = vmul.f32 128.0, %v1737_v60  ;;  %vm686_vm12 = vweird.f32 %v1737_v60 }
 0x216   :  { %v683_v62 = vsub.f32 1.0, %v682_v61 }
 0x218   :  { %v684_v63 = vmul.f32 %v1737_v60, %v683_v62  ;;  %v1646_v62 = vld [vmem:[%s2413_s4] sm:$0xff] }
 0x21a   :  { %v685_v1 = vadd.f32 %v1737_v60, %v684_v63 }
 0x21c   :  { %v2022_v2 = vsel %vm686_vm12, %v1737_v60, %v685_v1 }
 0x284   :  { %v468_v7 = vpop.xlane.xlu2 %467  ;;  %v406_v9 = vpop.xlane.xlu0 %405 }
 0x285   :  { %v469_v8 = vmul.f32 0.0051020407, %v468_v7  ;;  %v407_v10 = vmul.f32 0.0051020407, %v406_v9  ;;  %v1668_v9 = vld [vmem:[%s2413_s4 + $0xb0] sm:$0xff] }
 0x287   :  { %v470_v11 = vmul.f32 0.0, %v469_v8  ;;  %v410_v12 = vmul.f32 0.0, %v407_v10 }
 0x289   :  { %v474_v13 = vadd.f32 %v470_v11, %v407_v10  ;;  %v476_v14 = vadd.f32 %v469_v8, %v410_v12  ;;  %v1660_v8 = vld [vmem:[%s2413_s4 + $0x70] sm:$0xff]  ;;  %v1677_v10 = vld [vmem:[%s2413_s4 + $0xf8] sm:$0xff] }
 0x28a   :  { %v1652_v12 = vld [vmem:[%s2413_s4 + $0x30] sm:$0xff] }
 0x28b   :  { %v482_v16 = vrot.slane %v474_v13, 4  ;;  %v483_v18 = vrot.slane %v476_v14, 4 }
 0x28d   :  { %v484_v19 = vsel %vm278_vm2, %v474_v13, %v482_v16  ;;  %v485_v20 = vsel %vm278_vm2, %v476_v14, %v483_v18  ;;  %v1676_v16 = vld [vmem:[%s2413_s4 + $0xf0] sm:$0xff] }
 0x28e   :  { %v488_v22 = vadd.f32 %v484_v19, %v1959_v15  ;;  %v489_v24 = vadd.f32 %v485_v20, %v1964_v17  ;;  %v1659_v19 = vld [vmem:[%s2413_s4 + $0x68] sm:$0xff] }
 0x28f   :  { %v1667_v20 = vld [vmem:[%s2413_s4 + $0xa8] sm:$0xff] }
 0x290   :  { %492 = vst [vmem:[#allocation1] ss:$2 sm:$0xff] %v488_v22  ;;  %v1651_v22 = vld [vmem:[%s2413_s4 + $0x28] sm:$0xff] }
 0x291   :  { %494 = vst [vmem:[#allocation1 + $0x10] ss:$2 sm:$0xff] %v489_v24  ;;  %v1675_v24 = vld [vmem:[%s2413_s4 + $0xe8] sm:$0xff] }
 0x297   :  { %v495_v29 = vld.sshfl [vmem:[#allocation1] sm:$0xff pattern:$0x75316420]  ;;  %v496_v30 = vld.sshfl [vmem:[#allocation1 + $0x8] sm:$0xff pattern:$0x75316420] }
 0x298   :  { %v503_v31 = vpack.c.bf16 %v495_v29, %v495_v29  ;;  %v504_v32 = vpack.c.bf16 %v496_v30, %v496_v30  ;;  %729 = vst [vmem:[#allocation1] ss:$2 sm:$0xff] %v1976_v26  ;;  %v497_v33 = vld.sshfl [vmem:[#allocation1 + $0x10] sm:$0xff pattern:$0x75316420]  ;;  %v1650_v29 = vld [vmem:[%s2413_s4 + $0x20] sm:$0xff] }
 0x299   :  { %v505_v34 = vpack.c.bf16 %v497_v33, %v497_v33  ;;  %v498_v35 = vld.sshfl [vmem:[#allocation1 + $0x18] sm:$0xff pattern:$0x75316420]  ;;  %v1674_v30 = vld [vmem:[%s2413_s4 + $0xe0] sm:$0xff] }
 0x29a   :  { %v512_v37 = vsel %vm213_vm0, %v503_v31, 0  ;;  %v515_v38 = vsel %vm213_vm0, %v504_v32, 0  ;;  %v506_v41 = vpack.c.bf16 %v498_v35, %v498_v35  ;;  %731 = vst [vmem:[#allocation1 + $0x10] ss:$2 sm:$0xff] %v1981_v28  ;;  %v1657_v31 = vld [vmem:[%s2413_s4 + $0x58] sm:$0xff] }
 0x29b   :  { %530 = vmatpush.bf16.msrb.mxu0 %v512_v37  ;;  %543 = vmatpush.bf16.msrb.mxu1 %v515_v38  ;;  %v518_v42 = vsel %vm213_vm0, %v505_v34, 0  ;;  %v1665_v32 = vld [vmem:[%s2413_s4 + $0x98] sm:$0xff]  ;;  %v1656_v37 = vld [vmem:[%s2413_s4 + $0x50] sm:$0xff] }
 0x29c   :  { %556 = vmatpush.bf16.msrb.mxu2 %v518_v42  ;;  %v521_v44 = vsel %vm213_vm0, %v506_v41, 0  ;;  %v1649_v33 = vld [vmem:[%s2413_s4 + $0x18] sm:$0xff]  ;;  %v1664_v38 = vld [vmem:[%s2413_s4 + $0x90] sm:$0xff] }
 0x29d   :  { %569 = vmatpush.bf16.msrb.mxu3 %v521_v44  ;;  %v1673_v35 = vld [vmem:[%s2413_s4 + $0xd8] sm:$0xff]  ;;  %v1648_v42 = vld [vmem:[%s2413_s4 + $0x10] sm:$0xff]  ;;  %v1655_v44 = vld [vmem:[%s2413_s4 + $0x48] sm:$0xff] }
 0x29e   :  { %1366 = vmatmul.msk.bf16.vlgmr.msrb.gmra.mxu0 %vm507_vm11, %v155_v43  ;;  %1367 = vmatmul.msk.bf16.vlgmr.msrb.gmra.mxu1 %vm507_vm11, %v155_v43 }
 0x29f   :  { %670 = vmatpush.bf16.msra.mxu0 %v663_v36  ;;  %1368 = vmatmul.msk.bf16.vlgmr.msrb.gmra.mxu2 %vm507_vm11, %v155_v43  ;;  %v732_v63 = vld.sshfl [vmem:[#allocation1] sm:$0xff pattern:$0x75316420] }
 0x2a0   :  { %1369 = vmatmul.msk.bf16.vlgmr.msrb.gmra.mxu3 %vm507_vm11, %v155_v43  ;;  %949 = vmatpush.bf16.msra.mxu2 %v1661_v3  ;;  %v740_v1 = vpack.c.bf16 %v732_v63, %v732_v63  ;;  %v1670_v3 = vld [vmem:[%s2413_s4 + $0xc0] sm:$0xff] }
 0x2a1   :  { %962 = vmatpush.bf16.msra.mxu3 %v1669_v4  ;;  %936 = vmatpush.bf16.msra.mxu1 %v1653_v6  ;;  %v734_v59 = vld.sshfl [vmem:[#allocation1 + $0x10] sm:$0xff pattern:$0x75316420]  ;;  %v735_v4 = vld.sshfl [vmem:[#allocation1 + $0x18] sm:$0xff pattern:$0x75316420] }
 0x2a2   :  { %v742_v61 = vpack.c.bf16 %v734_v59, %v734_v59  ;;  %v1777_v6 = vmov 5  }
 0x2a3   :  { %671 = vmatpush.bf16.msra.mxu0 %v1645_v45  ;;  %v1663_v45 = vld [vmem:[%s2413_s4 + $0x88] sm:$0xff]  ;;  %1726 = vset.pattern.permute.xlu0 %v1777_v6 }
 0x2a4   :  { %950 = vmatpush.bf16.msra.mxu2 %v1660_v8 }
 0x2a5   :  { %963 = vmatpush.bf16.msra.mxu3 %v1668_v9  ;;  %937 = vmatpush.bf16.msra.mxu1 %v1652_v12 }
 0x2a7   :  { %672 = vmatpush.bf16.msra.mxu0 %v1644_v46 }
 0x2a8   :  { %951 = vmatpush.bf16.msra.mxu2 %v1659_v19 }
 0x2a9   :  { %964 = vmatpush.bf16.msra.mxu3 %v1667_v20  ;;  %938 = vmatpush.bf16.msra.mxu1 %v1651_v22 }
 0x2ab   :  { %975 = vmatpush.bf16.msrb.mxu0 %v1677_v10 }
 0x2ac   :  { %952 = vmatpush.bf16.msra.mxu2 %v1658_v25 }
 0x2ad   :  { %965 = vmatpush.bf16.msra.mxu3 %v1666_v27  ;;  %939 = vmatpush.bf16.msra.mxu1 %v1650_v29 }
 0x2ae   :  { %1378 = vmatmul.msk.bf16.vlgmr.msra.gmra.mxu0 %vm209_vm1, %v156_v49 }
 0x2af   :  { %976 = vmatpush.bf16.msrb.mxu0 %v1676_v16 }
 0x2b0   :  { %953 = vmatpush.bf16.msra.mxu2 %v1657_v31 }
 0x2b1   :  { %966 = vmatpush.bf16.msra.mxu3 %v1665_v32  ;;  %940 = vmatpush.bf16.msra.mxu1 %v1649_v33  ;;  %v157_v33 = vld [vmem:[%s2414_s9] sm:$0x3] }
 0x2b3   :  { %977 = vmatpush.bf16.msrb.mxu0 %v1675_v24 }
 0x2b4   :  { %954 = vmatpush.bf16.msra.mxu2 %v1656_v37 }
 0x2b5   :  { %967 = vmatpush.bf16.msra.mxu3 %v1664_v38  ;;  %941 = vmatpush.bf16.msra.mxu1 %v1648_v42  ;;  %v1778_v38 = vmov 6  }
 0x2b7   :  { %978 = vmatpush.bf16.msrb.mxu0 %v1674_v30 }
 0x2b8   :  { %955 = vmatpush.bf16.msra.mxu2 %v1655_v44 }
 0x2b9   :  { %968 = vmatpush.bf16.msra.mxu3 %v1663_v45 }
 0x2bb   :  { %979 = vmatpush.bf16.msrb.mxu0 %v1673_v35 }
 0x31b   :  { %v2007_v50 = vpop.f32.mrf.mxu0  ;;  %v2009_v51 = vpop.f32.mrf.mxu1 }
 0x322   :  { %v2011_v39 = vpop.f32.mrf.mxu2 }
 0x323   :  { %v534_v52 = vpop.f32.mrf.mxu0  ;;  %v2013_v40 = vpop.f32.mrf.mxu3  ;;  %v578_v6 = vsel %vm278_vm2, %v2011_v39, 0.0 }
 0x324   :  { %v547_v53 = vpop.f32.mrf.mxu1  ;;  %v1654_v52 = vld [vmem:[%s2413_s4 + $0x40] sm:$0xff] }
 0x325   :  { %956 = vmatpush.bf16.msra.mxu2 %v1654_v52 }
 0x32a   :  { %v560_v47 = vpop.f32.mrf.mxu2 }
 0x32b   :  { %v2015_v54 = vpop.f32.mrf.mxu0  ;;  %v573_v48 = vpop.f32.mrf.mxu3 }
 0x32c   :  { %v678_v55 = vsel %vm278_vm2, %v2015_v54, 0.0  ;;  %v689_v56 = vmul.f32 %v2015_v54, %v2015_v54 }
 0x32d   :  { %679 = vadd.xlane.f32.xlu1 %v678_v55  ;;  %v1647_v55 = vld [vmem:[%s2413_s4 + $0x8] sm:$0xff] }
 0x32e   :  { %v690_v57 = vsel %vm278_vm2, %v689_v56, 0.0  ;;  %v1662_v56 = vld [vmem:[%s2413_s4 + $0x80] sm:$0xff]  ;;  %942 = vmatpush.bf16.msra.mxu1 %v1647_v55 }
 0x32f   :  { %691 = vadd.xlane.f32.xlu0 %v690_v57  ;;  %v1672_v57 = vld [vmem:[%s2413_s4 + $0xd0] sm:$0xff]  ;;  %969 = vmatpush.bf16.msra.mxu3 %v1662_v56 }
 0x330   :  { %980 = vmatpush.bf16.msrb.mxu0 %v1672_v57 }
 0x332   :  { %970 = vmatmul.bf16.vlgmr.msra.gmra.mxu3 %v742_v61  ;;  %943 = vmatpush.bf16.msra.mxu1 %v1646_v62  ;;  %v594_v61 = vmul.f32 %v2011_v39, %v2011_v39 }
 0x333   :  { %v676_v58 = vpop.f32.mrf.mxu0 }
 0x334   :  { %v733_v58 = vld.sshfl [vmem:[#allocation1 + $0x8] sm:$0xff pattern:$0x75316420]  ;;  %981 = vmatpush.bf16.msrb.mxu0 %v1671_v0  ;;  %v595_v0 = vmul.f32 %v2013_v40, %v2013_v40 }
 0x335   :  { %v741_v60 = vpack.c.bf16 %v733_v58, %v733_v58  ;;  %944 = vmatmul.bf16.vlgmr.msra.gmra.mxu1 %v740_v1  ;;  %v599_v1 = vsel %vm278_vm2, %v594_v61, 0.0 }
 0x337   :  { %957 = vmatmul.bf16.vlgmr.msra.gmra.mxu2 %v741_v60  ;;  %v593_v60 = vmul.f32 %v2009_v51, %v2009_v51 }
 0x338   :  { %982 = vmatpush.bf16.msrb.mxu0 %v1670_v3  ;;  %v575_v3 = vsel %vm278_vm2, %v2007_v50, 0.0 }
 0x339   :  { %v597_v63 = vsel %vm278_vm2, %v593_v60, 0.0  ;;  %v1705_v60 = vld [vmem:[%s2415_s5 + $0xd4] sm:$0xf0] }
 0x3a0   :  { %v680_v5 = vpop.xlane.xlu1 %679 }
 0x3a1   :  { %v2034_v7 = vmul.f32 %v2022_v2, %v680_v5  ;;  %v743_v5 = vpack.c.bf16 %v735_v4, %v735_v4  ;;  %v576_v4 = vsel %vm278_vm2, %v2009_v51, 0.0 }
 0x3a2   :  { %v692_v11 = vpop.xlane.xlu0 %691 }
 0x3a3   :  { %v694_v13 = vmul.f32 %v2034_v7, %v2034_v7  ;;  %v693_v14 = vmul.f32 %v692_v11, %v2022_v2  ;;  %983 = vmatmul.bf16.vlgmr.msrb.gmra.mxu0 %v743_v5 }
 0x3a5   :  { %v695_v18 = vsub.f32 %v693_v14, %v694_v13 }
 0x3a7   :  { %v696_v23 = vadd.f32 1e-05, %v695_v18 }
 0x3a9   :  { %1738 = vrsqrt.f32 %v696_v23  ;;  %vm703_vm14 = vweird.f32 %v696_v23 }
 0x3af   :  { %v1739_v34 = vpop.eup %1738 }
 0x3b0   :  { %v698_v36 = vmul.f32 %v1739_v34, %v696_v23  ;;  %vm704_vm13 = vweird.f32 %v1739_v34 }
 0x3b1   :  { %vm705_vm15 = vmor %vm703_vm14, %vm704_vm13 }
 0x3b2   :  { %v699_v41 = vmul.f32 %v1739_v34, %v698_v36  ;;  %v945_v9 = vpop.f32.mrf.mxu1 }
 0x3b4   :  { %v700_v43 = vmul.f32 0.5, %v699_v41 }
 0x3b5   :  { %v971_v11 = vpop.f32.mrf.mxu3 }
 0x3b6   :  { %v701_v46 = vsub.f32 1.5, %v700_v43 }
 0x3b8   :  { %v702_v49 = vmul.f32 %v1739_v34, %v701_v46 }
 0x3ba   :  { %v706_v53 = vsel %vm705_vm15, %v1739_v34, %v702_v49  ;;  %v958_v10 = vpop.f32.mrf.mxu2  ;;  %v947_v13 = vpop.f32.mrf.mxu1 }
 0x3bb   :  { %v707_v47 = vmul.f32 %v706_v53, %v1939_v21  ;;  %v959_v19 = vadd.f32 %v958_v10, %v945_v9  ;;  %v601_v9 = vsel %vm278_vm2, %v595_v0, 0.0  ;;  %v1616_v0 = vld [vmem:[%s2415_s5 + $0xd8] sm:$0xf0] }
 0x3bd   :  { %716 = vperm.xlu2 %1725, %v707_v47   ;;  %v708_v48 = vmul.f32 %v707_v47, %v2034_v7  ;;  %v973_v16 = vpop.f32.mrf.mxu3  ;;  %v972_v22 = vadd.f32 %v971_v11, %v959_v19  ;;  %v1780_v19 = vmov 512.0  }
 0x3bf   :  { %710 = vrot.lane.b32.xlu0 %v708_v48, %s1772_s17 }
 0x3c2   :  { %v960_v14 = vpop.f32.mrf.mxu2 }
 0x3c3   :  { %v1779_v14 = vmov 7  }
 0x3c4   :  { %1728 = vset.pattern.permute.xlu1 %v1779_v14 }
 0x3c5   :  { %1727 = vset.pattern.permute.xlu2 %v1778_v38  ;;  %v1622_v38 = vld [vmem:[%s2415_s5 + $0xe0] sm:$0xf] }
 0x417   :  { %v717_v20 = vpop.permute.xlu2 %716 }
 0x418   :  { %v719_v23 = vmul.f32 %v717_v20, %v2015_v54 }
 0x420   :  { %v984_v12 = vpop.f32.mrf.mxu0 }
 0x421   :  { %v985_v25 = vadd.f32 %v984_v12, %v972_v22  ;;  %v580_v12 = vsel %vm278_vm2, %v2013_v40, 0.0 }
 0x428   :  { %v986_v18 = vpop.f32.mrf.mxu0 }
 0x431   :  { %v711_v7 = vpop.permute.xlu0 %710 }
 0x432   :  { %v713_v8 = vsub.f32 %v1939_v21, %v711_v7 }
 0x434   :  { %722 = vperm.xlu0 %1726, %v713_v8   ;;  %v577_v8 = vadd.f32 %v576_v4, %v575_v3  ;;  %v1700_v4 = vld [vmem:[%s2415_s5 + $0xac] sm:$0xf0] }
 0x436   :  { %v579_v10 = vadd.f32 %v578_v6, %v577_v8  ;;  %v1592_v6 = vld [vmem:[%s2415_s5 + $0xb0] sm:$0xf0]  ;;  %v1598_v8 = vld [vmem:[%s2415_s5 + $0xa8] sm:$0xf] }
 0x438   :  { %v581_v13 = vadd.f32 %v580_v12, %v579_v10  ;;  %v1699_v10 = vld [vmem:[%s2415_s5 + $0xac] sm:$0xf] }
 0x43c   :  { %1731 = vset.pattern.permute.xlu0 %v1779_v14  ;;  %v1574_v14 = vld [vmem:[%s2415_s5 + $0x80] sm:$0xf] }
 0x4a6   :  { %v723_v24 = vpop.permute.xlu0 %722 }
 0x4a7   :  { %v725_v27 = vadd.f32 %v723_v24, %v719_v23 }
 0x4a9   :  { %v726_v29 = vmax.f32 %v725_v27, 0.0 }
 0x4ab   :  { %v988_v30 = vadd.f32 %v985_v25, %v726_v29 }
 0x4ad   :  { %v989_v31 = vpack.c.bf16 %v988_v30, %v988_v30 }
 0x4af   :  { %v994_v32 = vsel %vm213_vm0, %v989_v31, 0 }
 0x4b0   :  { %1003 = vmatpush.bf16.msrb.mxu1 %v994_v32  ;;  %v1781_v32 = vmov 2  }
 0x4b3   :  { %1507 = vmatmul.msk.bf16.vlgmr.msrb.gmra.mxu1 %vm507_vm11, %v157_v33 }
 0x530   :  { %v2136_v34 = vpop.f32.mrf.mxu1 }
 0x531   :  { %v1009_v54 = vsel %vm278_vm2, %v2136_v34, 0.0  ;;  %v1013_v35 = vmul.f32 %v2136_v34, %v2136_v34 }
 0x532   :  { %1010 = vadd.xlane.f32.xlu1 %v1009_v54 }
 0x533   :  { %v1014_v37 = vsel %vm278_vm2, %v1013_v35, 0.0 }
 0x538   :  { %v1007_v36 = vpop.f32.mrf.mxu1 }
 0x53a   :  { %1015 = vadd.xlane.f32.xlu1 %v1014_v37 }
 0x5a5   :  { %v1011_v41 = vpop.xlane.xlu1 %1010 }
 0x5a6   :  { %v1012_v42 = vmul.f32 %v1011_v41, %v2022_v2  ;;  %v1708_v41 = vld [vmem:[%s2415_s5 + $0xec] sm:$0xf0] }
 0x5a8   :  { %v1018_v44 = vmul.f32 %v1012_v42, %v1012_v42 }
 0x5ad   :  { %v1016_v43 = vpop.xlane.xlu1 %1015 }
 0x5ae   :  { %v1017_v45 = vmul.f32 %v1016_v43, %v2022_v2  ;;  %v592_v2 = vmul.f32 %v2007_v50, %v2007_v50  ;;  %v1706_v43 = vld [vmem:[%s2415_s5 + $0xe4] sm:$0xf] }
 0x5b0   :  { %v1019_v46 = vsub.f32 %v1017_v45, %v1018_v44  ;;  %v596_v62 = vsel %vm278_vm2, %v592_v2, 0.0  ;;  %v1624_v44 = vld [vmem:[%s2415_s5 + $0xf0] sm:$0xf0]  ;;  %v1630_v45 = vld [vmem:[%s2415_s5 + $0xe8] sm:$0xf] }
 0x5b1   :  { %v598_v5 = vadd.f32 %v597_v63, %v596_v62  ;;  %v1614_v2 = vld [vmem:[%s2415_s5 + $0xc8] sm:$0xf]  ;;  %v1703_v63 = vld [vmem:[%s2415_s5 + $0xcc] sm:$0xf] }
 0x5b2   :  { %v1020_v49 = vadd.f32 1e-05, %v1019_v46  ;;  %v1627_v46 = vor.u32 %v1706_v43, %v1624_v44  ;;  %v1615_v62 = vor.u32 %v1705_v60, %v1614_v2  ;;  %v1619_v3 = vor.u32 %v1703_v63, %v1616_v0  ;;  %v1560_v44 = vld [vmem:[%s2415_s5 + $0x70] sm:$0xf0]  ;;  %v1686_v2 = vld [vmem:[%s2415_s5 + $0x44] sm:$0xf] }
 0x5b3   :  { %v600_v7 = vadd.f32 %v599_v1, %v598_v5  ;;  %v1590_v1 = vld [vmem:[%s2415_s5 + $0xa0] sm:$0xf]  ;;  %v1698_v5 = vld [vmem:[%s2415_s5 + $0xa4] sm:$0xf]  ;;  %v1544_v60 = vld [vmem:[%s2415_s5 + $0x50] sm:$0xf0] }
 0x5b4   :  { %1740 = vrsqrt.f32 %v1020_v49  ;;  %vm1027_vm1 = vweird.f32 %v1020_v49  ;;  %1224 = vmatpush.bf16.msrb.mxu3 %v1627_v46  ;;  %v1595_v12 = vor.u32 %v1698_v5, %v1592_v6  ;;  %v1693_v46 = vld [vmem:[%s2415_s5 + $0x74] sm:$0xf0]  ;;  %v1687_v63 = vld [vmem:[%s2415_s5 + $0x4c] sm:$0xf]  ;;  %v1552_v0 = vld [vmem:[%s2415_s5 + $0x58] sm:$0xf0]  ;;  %v1547_v5 = vor.u32 %v1686_v2, %v1544_v60 }
 0x5b5   :  { %v602_v11 = vadd.f32 %v601_v9, %v600_v7  ;;  %1742 = vrcp.f32 %v1780_v19  ;;  %v1591_v7 = vor.u32 %v1700_v4, %v1590_v1  ;;  %v1701_v9 = vld [vmem:[%s2415_s5 + $0xb4] sm:$0xf0]  ;;  %v1526_v6 = vld [vmem:[%s2415_s5 + $0x20] sm:$0xf] }
 0x5b6   :  { %v1599_v19 = vor.u32 %v1701_v9, %v1598_v8  ;;  %v1555_v9 = vor.u32 %v1687_v63, %v1552_v0 }
 0x5ba   :  { %v1741_v52 = vpop.eup %1740 }
 0x5bb   :  { %v1022_v53 = vmul.f32 %v1741_v52, %v1020_v49  ;;  %vm1028_vm0 = vweird.f32 %v1741_v52  ;;  %v1743_v20 = vpop.eup %1742  ;;  %v1709_v49 = vld [vmem:[%s2415_s5 + $0xf4] sm:$0xf0] }
 0x5bc   :  { %vm1029_vm3 = vmor %vm1027_vm1, %vm1028_vm0  ;;  %v585_v22 = vmul.f32 512.0, %v1743_v20  ;;  %vm589_vm4 = vweird.f32 %v1743_v20 }
 0x5bd   :  { %v1023_v47 = vmul.f32 %v1741_v52, %v1022_v53  ;;  %v1632_v53 = vld [vmem:[%s2415_s5 + $0xf8] sm:$0xf0] }
 0x5be   :  { %v586_v23 = vsub.f32 1.0, %v585_v22  ;;  %v1694_v22 = vld [vmem:[%s2415_s5 + $0x84] sm:$0xf] }
 0x5bf   :  { %v1024_v48 = vmul.f32 0.5, %v1023_v47  ;;  %v1631_v47 = vor.u32 %v1709_v49, %v1630_v45  ;;  %v1566_v45 = vld [vmem:[%s2415_s5 + $0x68] sm:$0xf]  ;;  %v1691_v49 = vld [vmem:[%s2415_s5 + $0x6c] sm:$0xf] }
 0x5c0   :  { %v587_v25 = vmul.f32 %v1743_v20, %v586_v23  ;;  %v1576_v23 = vld [vmem:[%s2415_s5 + $0x90] sm:$0xf0] }
 0x5c1   :  { %v1025_v55 = vsub.f32 1.5, %v1024_v48  ;;  %1237 = vmatpush.bf16.msra.mxu0 %v1631_v47 }
 0x5c2   :  { %v588_v27 = vadd.f32 %v1743_v20, %v587_v25  ;;  %v1582_v25 = vld [vmem:[%s2415_s5 + $0x88] sm:$0xf] }
 0x5c3   :  { %v1026_v56 = vmul.f32 %v1741_v52, %v1025_v55  ;;  %v1606_v55 = vld [vmem:[%s2415_s5 + $0xc0] sm:$0xf] }
 0x5c4   :  { %v590_v29 = vsel %vm589_vm4, %v1743_v20, %v588_v27  ;;  %v1697_v27 = vld [vmem:[%s2415_s5 + $0x94] sm:$0xf0] }
 0x5c5   :  { %v1030_v57 = vsel %vm1029_vm3, %v1741_v52, %v1026_v56  ;;  %v1707_v52 = vld [vmem:[%s2415_s5 + $0xec] sm:$0xf]  ;;  %v1704_v56 = vld [vmem:[%s2415_s5 + $0xcc] sm:$0xf0]  ;;  %1238 = vmatpush.bf16.msra.mxu0 %v1615_v62  ;;  %v1689_v62 = vld [vmem:[%s2415_s5 + $0x54] sm:$0xf0] }
 0x5c6   :  { %v1031_v58 = vmul.f32 %v1030_v57, %v1939_v21  ;;  %v1635_v48 = vor.u32 %v1707_v52, %v1632_v53  ;;  %v1702_v57 = vld [vmem:[%s2415_s5 + $0xc4] sm:$0xf]  ;;  %v1568_v52 = vld [vmem:[%s2415_s5 + $0x78] sm:$0xf0] }
 0x5c8   :  { %1040 = vperm.xlu2 %1727, %v1031_v58   ;;  %v1032_v59 = vmul.f32 %v1031_v58, %v1012_v42  ;;  %v1623_v42 = vor.u32 %v1708_v41, %v1622_v38  ;;  %v1607_v58 = vor.u32 %v1704_v56, %v1606_v55  ;;  %1250 = vmatpush.bf16.msra.mxu1 %v1635_v48  ;;  %v1690_v38 = vld [vmem:[%s2415_s5 + $0x64] sm:$0xf]  ;;  %v1542_v56 = vld [vmem:[%s2415_s5 + $0x40] sm:$0xf] }
 0x5c9   :  { %1239 = vmatpush.bf16.msra.mxu0 %v1599_v19  ;;  %v1563_v55 = vor.u32 %v1690_v38, %v1560_v44  ;;  %v1520_v38 = vld [vmem:[%s2415_s5 + $0x18] sm:$0xf0] }
 0x5ca   :  { %1034 = vrot.lane.b32.xlu0 %v1032_v59, %s1772_s17  ;;  %1211 = vmatpush.bf16.msrb.mxu2 %v1623_v42  ;;  %v1608_v59 = vld [vmem:[%s2415_s5 + $0xd0] sm:$0xf0]  ;;  %v1583_v42 = vor.u32 %v1697_v27, %v1582_v25  ;;  %v1680_v25 = vld [vmem:[%s2415_s5 + $0xc] sm:$0xf0]  ;;  %v1678_v27 = vld [vmem:[%s2415_s5 + $0x4] sm:$0xf] }
 0x5cb   :  { %v1611_v61 = vor.u32 %v1702_v57, %v1608_v59  ;;  %v1688_v57 = vld [vmem:[%s2415_s5 + $0x4c] sm:$0xf0]  ;;  %v1571_v59 = vor.u32 %v1691_v49, %v1568_v52 }
 0x5cc   :  { %1251 = vmatpush.bf16.msra.mxu1 %v1619_v3  ;;  %v1543_v3 = vor.u32 %v1688_v57, %v1542_v56 }
 0x5cd   :  { %1225 = vmatpush.bf16.msrb.mxu3 %v1611_v61  ;;  %1240 = vmatpush.bf16.msra.mxu0 %v1583_v42  ;;  %v1550_v61 = vld [vmem:[%s2415_s5 + $0x48] sm:$0xf] }
 0x5ce   :  { %1212 = vmatpush.bf16.msrb.mxu2 %v1607_v58  ;;  %v1551_v8 = vor.u32 %v1689_v62, %v1550_v61 }
 0x5d1   :  { %1226 = vmatpush.bf16.msrb.mxu3 %v1595_v12  ;;  %v1534_v12 = vld [vmem:[%s2415_s5 + $0x28] sm:$0xf] }
 0x5d2   :  { %1213 = vmatpush.bf16.msrb.mxu2 %v1591_v7  ;;  %v1684_v7 = vld [vmem:[%s2415_s5 + $0x2c] sm:$0xf0] }
 0x5d3   :  { %v1527_v19 = vor.u32 %v1684_v7, %v1526_v6 }
 0x5f1   :  { %603 = vadd.xlane.f32.xlu2 %v602_v11 }
 0x5f4   :  { %582 = vadd.xlane.f32.xlu0 %v581_v13  ;;  %v1600_v13 = vld [vmem:[%s2415_s5 + $0xb8] sm:$0xf0] }
 0x5f5   :  { %v1603_v20 = vor.u32 %v1699_v10, %v1600_v13  ;;  %v1682_v10 = vld [vmem:[%s2415_s5 + $0x24] sm:$0xf] }
 0x5f7   :  { %1252 = vmatpush.bf16.msra.mxu1 %v1603_v20 }
 0x622   :  { %v2168_v24 = vpop.permute.xlu2 %1040 }
 0x623   :  { %v1043_v42 = vmul.f32 %v2168_v24, %v2136_v34 }
 0x63c   :  { %v1035_v16 = vpop.permute.xlu0 %1034 }
 0x63d   :  { %v1037_v18 = vsub.f32 %v1939_v21, %v1035_v16  ;;  %v1696_v16 = vld [vmem:[%s2415_s5 + $0x8c] sm:$0xf0] }
 0x63f   :  { %1046 = vperm.xlu1 %1728, %v1037_v18  }
 0x647   :  { %1729 = vset.pattern.permute.xlu1 %v1781_v32  ;;  %v1584_v32 = vld [vmem:[%s2415_s5 + $0x98] sm:$0xf0] }
 0x664   :  { %v604_v30 = vpop.xlane.xlu2 %603 }
 0x665   :  { %v605_v54 = vmul.f32 %v604_v30, %v590_v29 }
 0x667   :  { %v583_v31 = vpop.xlane.xlu0 %582 }
 0x668   :  { %v2170_v33 = vmul.f32 %v590_v29, %v583_v31  ;;  %v1695_v29 = vld [vmem:[%s2415_s5 + $0x8c] sm:$0xf]  ;;  %v1575_v31 = vor.u32 %v1696_v16, %v1574_v14  ;;  %v1685_v14 = vld [vmem:[%s2415_s5 + $0x34] sm:$0xf0] }
 0x669   :  { %v1587_v43 = vor.u32 %v1695_v29, %v1584_v32  ;;  %v1683_v16 = vld [vmem:[%s2415_s5 + $0x2c] sm:$0xf]  ;;  %v1681_v32 = vld [vmem:[%s2415_s5 + $0x14] sm:$0xf0] }
 0x66a   :  { %v606_v35 = vmul.f32 %v2170_v33, %v2170_v33  ;;  %1214 = vmatpush.bf16.msrb.mxu2 %v1575_v31  ;;  %v1518_v31 = vld [vmem:[%s2415_s5 + $0x8] sm:$0xf] }
 0x66b   :  { %1253 = vmatpush.bf16.msra.mxu1 %v1587_v43 }
 0x66c   :  { %v607_v36 = vsub.f32 %v605_v54, %v606_v35  ;;  %v1579_v54 = vor.u32 %v1694_v22, %v1576_v23  ;;  %v1558_v35 = vld [vmem:[%s2415_s5 + $0x60] sm:$0xf] }
 0x66d   :  { %v1510_v23 = vld [vmem:[%s2415_s5] sm:$0xf] }
 0x66e   :  { %v2174_v37 = vadd.f32 1e-05, %v607_v36  ;;  %v1692_v36 = vld [vmem:[%s2415_s5 + $0x6c] sm:$0xf0]  ;;  %1227 = vmatpush.bf16.msrb.mxu3 %v1579_v54  ;;  %v1511_v29 = vor.u32 %v1680_v25, %v1510_v23 }
 0x66f   :  { %v1559_v47 = vor.u32 %v1692_v36, %v1558_v35  ;;  %1254 = vmatpush.bf16.msra.mxu1 %v1571_v59  ;;  %v1519_v35 = vor.u32 %v1681_v32, %v1518_v31  ;;  %v1679_v36 = vld [vmem:[%s2415_s5 + $0xc] sm:$0xf] }
 0x670   :  { %1744 = vrsqrt.f32 %v2174_v37  ;;  %vm615_vm6 = vweird.f32 %v2174_v37 }
 0x671   :  { %1215 = vmatpush.bf16.msrb.mxu2 %v1559_v47 }
 0x672   :  { %1228 = vmatpush.bf16.msrb.mxu3 %v1563_v55 }
 0x673   :  { %1255 = vmatpush.bf16.msra.mxu1 %v1555_v9 }
 0x675   :  { %1216 = vmatpush.bf16.msrb.mxu2 %v1543_v3 }
 0x676   :  { %v1745_v11 = vpop.eup %1744  ;;  %1229 = vmatpush.bf16.msrb.mxu3 %v1547_v5 }
 0x677   :  { %v610_v18 = vmul.f32 %v1745_v11, %v2174_v37  ;;  %vm616_vm5 = vweird.f32 %v1745_v11  ;;  %v1567_v37 = vor.u32 %v1693_v46, %v1566_v45  ;;  %v1782_v46 = vmov 3  }
 0x678   :  { %vm2299_vm7 = vmor %vm615_vm6, %vm616_vm5 }
 0x679   :  { %v611_v30 = vmul.f32 %v1745_v11, %v610_v18  ;;  %1241 = vmatpush.bf16.msra.mxu0 %v1567_v37  ;;  %v1536_v18 = vld [vmem:[%s2415_s5 + $0x38] sm:$0xf0]  ;;  %1217 = vmatpush.bf16.msrb.mxu2 %v1527_v19 }
 0x67a   :  { %v1539_v22 = vor.u32 %v1683_v16, %v1536_v18 }
 0x67b   :  { %v612_v41 = vmul.f32 0.5, %v611_v30  ;;  %v1512_v30 = vld [vmem:[%s2415_s5 + $0x10] sm:$0xf0] }
 0x67c   :  { %1256 = vmatpush.bf16.msra.mxu1 %v1539_v22  ;;  %v1515_v54 = vor.u32 %v1678_v27, %v1512_v30  ;;  %v1288_v27 = vsub.f32 %v1964_v17, %v1981_v28 }
 0x67d   :  { %v613_v53 = vsub.f32 1.5, %v612_v41  ;;  %1242 = vmatpush.bf16.msra.mxu0 %v1551_v8  ;;  %1218 = vmatpush.bf16.msrb.mxu2 %v1511_v29  ;;  %v1523_v41 = vor.u32 %v1679_v36, %v1520_v38 }
 0x67f   :  { %v614_v58 = vmul.f32 %v1745_v11, %v613_v53 }
 0x680   :  { %1257 = vmatpush.bf16.msra.mxu1 %v1523_v41 }
 0x681   :  { %v618_v1 = vsel %vm2299_vm7, %v1745_v11, %v614_v58  ;;  %v1528_v11 = vld [vmem:[%s2415_s5 + $0x30] sm:$0xf0] }
 0x682   :  { %v619_v4 = vmul.f32 %v618_v1, %v1939_v21  ;;  %v1531_v20 = vor.u32 %v1682_v10, %v1528_v11 }
 0x684   :  { %v620_v13 = vmul.f32 %v619_v4, %v2170_v33  ;;  %v1535_v33 = vor.u32 %v1685_v14, %v1534_v12  ;;  %1230 = vmatpush.bf16.msrb.mxu3 %v1531_v20 }
 0x686   :  { %622 = vrot.lane.b32.xlu1 %v620_v13, %s1772_s17  ;;  %1243 = vmatpush.bf16.msra.mxu0 %v1535_v33  ;;  %v1287_v33 = vsub.f32 %v1959_v15, %v1976_v26 }
 0x688   :  { %1231 = vmatpush.bf16.msrb.mxu3 %v1515_v54 }
 0x68a   :  { %1244 = vmatpush.bf16.msra.mxu0 %v1519_v35 }
 0x68e   :  { %628 = vperm.xlu1 %1729, %v619_v4  }
 0x696   :  { %1730 = vset.pattern.permute.xlu1 %v1782_v46 }
 0x6b1   :  { %v1047_v43 = vpop.permute.xlu1 %1046 }
 0x6b2   :  { %v1049_v44 = vadd.f32 %v1047_v43, %v1043_v42 }
 0x6b4   :  { %v1050_v45 = vpack.c.bf16 %v1049_v44, %v1049_v44 }
 0x6b6   :  { %1219 = vmatmul.bf16.vlgmr.msrb.gmra.mxu2 %v1050_v45  ;;  %1232 = vmatmul.bf16.vlgmr.msrb.gmra.mxu3 %v1050_v45 }
 0x6b7   :  { %1245 = vmatmul.bf16.vlgmr.msra.gmra.mxu0 %v1050_v45  ;;  %1258 = vmatmul.bf16.vlgmr.msra.gmra.mxu1 %v1050_v45 }
 0x6f8   :  { %v623_v49 = vpop.permute.xlu1 %622 }
 0x6f9   :  { %v625_v52 = vsub.f32 %v1939_v21, %v623_v49 }
 0x6fb   :  { %637 = vperm.xlu1 %1730, %v625_v52  }
 0x700   :  { %v629_v58 = vpop.permute.xlu1 %628 }
 0x701   :  { %v631_v37 = vmul.f32 %v629_v58, %v2007_v50  ;;  %v632_v59 = vmul.f32 %v629_v58, %v2009_v51  ;;  %v633_v2 = vmul.f32 %v629_v58, %v2011_v39  ;;  %v634_v60 = vmul.f32 %v629_v58, %v2013_v40 }
 0x734   :  { %v1246_v53 = vpop.f32.mrf.mxu0  ;;  %v1259_v47 = vpop.f32.mrf.mxu1 }
 0x739   :  { %v1220_v48 = vpop.f32.mrf.mxu2  ;;  %v1233_v55 = vpop.f32.mrf.mxu3 }
 0x73c   :  { %v1248_v56 = vpop.f32.mrf.mxu0  ;;  %v1261_v57 = vpop.f32.mrf.mxu1 }
 0x73d   :  { %v1316_v56 = vadd.f32 %v1981_v28, %v1964_v17 }
 0x741   :  { %v1222_v34 = vpop.f32.mrf.mxu2  ;;  %v1235_v24 = vpop.f32.mrf.mxu3 }
 0x76d   :  { %v638_v61 = vpop.permute.xlu1 %637 }
 0x76e   :  { %v640_v21 = vadd.f32 %v638_v61, %v631_v37  ;;  %v641_v62 = vadd.f32 %v638_v61, %v632_v59  ;;  %v642_v63 = vadd.f32 %v638_v61, %v633_v2  ;;  %v643_v0 = vadd.f32 %v638_v61, %v634_v60 }
 0x770   :  { %v1263_v1 = vadd.f32 %v1220_v48, %v640_v21  ;;  %v1264_v3 = vadd.f32 %v1233_v55, %v641_v62  ;;  %v1265_v4 = vadd.f32 %v1246_v53, %v642_v63  ;;  %v1266_v5 = vadd.f32 %v1259_v47, %v643_v0 }
 0x771   :  { %v1315_v48 = vadd.f32 %v1976_v26, %v1959_v15 }
 0x772   :  { %v1267_v6 = vsub.f32 0.0, %v1263_v1  ;;  %v1268_v7 = vsub.f32 0.0, %v1264_v3  ;;  %v1269_v8 = vsub.f32 0.0, %v1265_v4  ;;  %v1270_v9 = vsub.f32 0.0, %v1266_v5 }
 0x774   :  { %v1271_v50 = vmul.f32 1.442695, %v1267_v6  ;;  %v1273_v10 = vmul.f32 1.442695, %v1268_v7  ;;  %v1275_v51 = vmul.f32 1.442695, %v1269_v8 }
 0x775   :  { %v1277_v11 = vmul.f32 1.442695, %v1270_v9 }
 0x776   :  { %1746 = vpow2.f32 %v1271_v50 }
 0x777   :  { %1748 = vpow2.f32 %v1273_v10 }
 0x778   :  { %1750 = vpow2.f32 %v1275_v51 }
 0x779   :  { %1752 = vpow2.f32 %v1277_v11 }
 0x77c   :  { %v1747_v39 = vpop.eup %1746 }
 0x77d   :  { %v1749_v40 = vpop.eup %1748  ;;  %v1279_v12 = vadd.f32 1.0, %v1747_v39 }
 0x77e   :  { %v1751_v13 = vpop.eup %1750  ;;  %v1280_v14 = vadd.f32 1.0, %v1749_v40 }
 0x77f   :  { %v1753_v16 = vpop.eup %1752  ;;  %v1281_v18 = vadd.f32 1.0, %v1751_v13 }
 0x780   :  { %v1282_v19 = vadd.f32 1.0, %v1753_v16  ;;  %1754 = vrcp.f32 %v1280_v14 }
 0x781   :  { %1756 = vrcp.f32 %v1279_v12 }
 0x782   :  { %1758 = vrcp.f32 %v1282_v19 }
 0x783   :  { %1760 = vrcp.f32 %v1281_v18 }
 0x786   :  { %v1755_v20 = vpop.eup %1754 }
 0x787   :  { %v1757_v22 = vpop.eup %1756  ;;  %v1293_v23 = vrot.slane %v1755_v20, 4 }
 0x788   :  { %v1759_v25 = vpop.eup %1758 }
 0x789   :  { %v1294_v29 = vrot.slane %v1759_v25, 4  ;;  %v1295_v30 = vsel %vm278_vm2, %v1757_v22, %v1293_v23  ;;  %v1761_v31 = vpop.eup %1760 }
 0x78a   :  { %v1299_v32 = vmul.f32 %v1295_v30, %v1287_v33 }
 0x78b   :  { %v1296_v54 = vsel %vm278_vm2, %v1761_v31, %v1294_v29 }
 0x78c   :  { %v1300_v35 = vmul.f32 %v1296_v54, %v1288_v27  ;;  %v1301_v36 = vadd.f32 %v1299_v32, %v1976_v26 }
 0x78e   :  { %v1302_v38 = vadd.f32 %v1300_v35, %v1981_v28  ;;  %v1303_v41 = vmul.f32 2.0, %v1301_v36 }
 0x790   :  { %v1304_v42 = vmul.f32 2.0, %v1302_v38  ;;  %v1305_v43 = vsub.f32 0.0, %v1303_v41 }
 0x792   :  { %v1306_v44 = vsub.f32 0.0, %v1304_v42  ;;  %v1307_v45 = vmul.f32 1.442695, %v1305_v43 }
 0x794   :  { %1762 = vpow2.f32 %v1307_v45  ;;  %v1309_v46 = vmul.f32 1.442695, %v1306_v44 }
 0x796   :  { %1764 = vpow2.f32 %v1309_v46 }
 0x79a   :  { %v1763_v49 = vpop.eup %1762 }
 0x79b   :  { %v1311_v52 = vadd.f32 1.0, %v1763_v49 }
 0x79c   :  { %v1765_v53 = vpop.eup %1764 }
 0x79d   :  { %v1312_v47 = vadd.f32 1.0, %v1765_v53  ;;  %1766 = vrcp.f32 %v1311_v52 }
 0x79f   :  { %1768 = vrcp.f32 %v1312_v47 }
 0x7a3   :  { %v1767_v55 = vpop.eup %1766 }
 0x7a4   :  { %v1317_v57 = vadd.f32 1.0, %v1767_v55 }
 0x7a5   :  { %v1769_v34 = vpop.eup %1768 }
 0x7a6   :  { %v1318_v24 = vadd.f32 1.0, %v1769_v34  ;;  %v1319_v58 = vmul.f32 %v1317_v57, %v1315_v48 }
 0x7a8   :  { %v1320_v37 = vmul.f32 %v1318_v24, %v1316_v56  ;;  %1321 = vst [vmem:[%s2416_s11] sm:$0xff] %v1319_v58 }
 0x7aa   :  { %1322 = vst [vmem:[%s2416_s11 + $0x8] sm:$0xff] %v1320_v37 }

</bundles_post_ra>
